<compile_context>
chip_gen: v5e
topology: v5e:2x2
jax: 0.10.0
libtpu: 0.0.40
codegen_flags: <defaults>
</compile_context>

<pallas_src>
import functools

import jax
import jax.numpy as jnp
from jax import lax
from jax.experimental import pallas as pl
from jax.experimental.pallas import tpu as pltpu

GROUP_DIM = 8        # module-level `group_dim`
EPS = 1e-5           # nn.GroupNorm default eps

_TAPS = tuple((dy, dx) for dy in (-1, 0, 1) for dx in (-1, 0, 1))


def _basic_block_kernel(x_ref, w1_ref, g1_ref, b1_ref, w2_ref, g2_ref, b2_ref,
                        masks_ref, sel_ref, expand_ref, mgrp2_ref,
                        out_ref, patches_ref,
                        *, H, W, C, NB, mm_dtype, tap_dtype):
    """Fused BasicBlock forward over NB lane-batched images.

    x_ref      : (1, C, NB*H*W) f32   channels on sublanes, all pixels of all NB images
                                      on lanes; also serves as the residual.
    w*_ref     : (C, 9*C) mm_dtype    conv weights, col index = tap*C + cin.
    g*/b*_ref  : (C, 1) f32           GroupNorm gamma / beta.
    masks_ref  : (9*C, NB*H*W)        per-tap boundary-validity masks (tap_dtype).
    sel_ref    : (NB*H*W, NBX) f32    per-image lane selector, scaled by 1/(CG*H*W).
    expand_ref : (NBX, NB*H*W) f32    per-image lane indicator (scale/shift broadcast).
    mgrp2_ref  : (2C, 2C) f32         blockdiag(group-membership, group-membership).
    out_ref    : (1, C, NB*H*W) f32
    patches_ref: (9*C, NB*H*W) mm_dtype  VMEM scratch for the im2col patches.
    """
    P = H * W
    NBP = NB * P

    w1 = w1_ref[...]
    w2 = w2_ref[...]
    sel = sel_ref[...]
    expand = expand_ref[...]
    mgrp2 = mgrp2_ref[...]

    def conv3x3(img, w_flat):
        # 3x3 / stride-1 / pad-1 conv over all NB images as a single
        # (C,9C)@(9C,NB*P) MXU matmul.  Each tap = one lane roll (XLU) + one mask
        # multiply (VPU) over the whole slab, stored straight into the patches scratch.
        img_c = img.astype(tap_dtype)
        for t, (dy, dx) in enumerate(_TAPS):
            shift = (-(dy * W + dx)) % NBP
            r = img_c if shift == 0 else pltpu.roll(img_c, shift=shift, axis=1)
            m = masks_ref[t * C:(t + 1) * C, :]
            patches_ref[t * C:(t + 1) * C, :] = (r * m).astype(mm_dtype)
        return jnp.dot(w_flat, patches_ref[...],
                       preferred_element_type=jnp.float32)              # (C, NBP) f32

    def group_norm(y, gamma, beta):
        # Per-image / per-channel sums of y and y^2 on the MXU (selector already has
        # 1/(CG*P) folded in), group combine as one (2C,2C)@(2C,NBX) matmul, then the
        # per-image scale/shift are expanded back to lanes with one (2C,NBX)@(NBX,NBP)
        # matmul.  All GroupNorm arithmetic stays in f32.
        s = jnp.dot(y, sel, preferred_element_type=jnp.float32)         # (C, NBX)
        q = jnp.dot(y * y, sel, preferred_element_type=jnp.float32)     # (C, NBX)
        st = jnp.concatenate([s, q], axis=0)                            # (2C, NBX)
        stats = jnp.dot(mgrp2, st, preferred_element_type=jnp.float32)  # (2C, NBX)
        gmean = stats[:C]
        gmsq = stats[C:]
        gvar = jnp.maximum(gmsq - gmean * gmean, 0.0)                   # guard cancellation
        inv = lax.rsqrt(gvar + EPS)
        scale = inv * gamma                                             # (C, NBX)
        shift = beta - gmean * scale
        sc_sh = jnp.concatenate([scale, shift], axis=0)                 # (2C, NBX)
        full = jnp.dot(sc_sh, expand, preferred_element_type=jnp.float32)  # (2C, NBP)
        return y * full[:C] + full[C:]

    y1 = conv3x3(x_ref[0], w1)
    y1 = jnp.maximum(group_norm(y1, g1_ref[...], b1_ref[...]), 0.0)
    y2 = group_norm(conv3x3(y1, w2), g2_ref[...], b2_ref[...])
    out_ref[0] = jnp.maximum(y2 + x_ref[0], 0.0)                        # residual + ReLU


# ------------------------------ host-side helpers ---------------------------------

def _dtype_bytes(dt):
    return jnp.dtype(dt).itemsize


def _vmem_estimate_bytes(C, NBP, tap_bytes, mm_bytes):
    blocks = 2 * 2 * C * NBP * 4            # double-buffered (1,C,NBP) f32 in + out
    masks = 2 * 9 * C * NBP * tap_bytes     # mask input (conservatively double-buffered)
    patch = 9 * C * NBP * mm_bytes          # im2col patches scratch
    sel = 2 * NBP * 128 * 4                 # (NBP, NBX) selector, lane-padded to 128
    interm = 6 * C * NBP * 4                # live f32 intermediates (y, y*y, full, ...)
    return blocks + masks + patch + sel + interm


def _pick_nb(N, C, P, tap_bytes, mm_bytes, budget_bytes=20 * 1024 * 1024):
    # Images per grid step: amortize the ~0.35us/step overhead, but keep the grid >= 2
    # (both v7x TensorCores get work, block DMAs pipeline) and stay inside a VMEM budget
    # that also fits v7x's smaller 64 MiB VMEM.
    for cand in (8, 4, 2):
        if N % cand != 0 or N // cand < 2:
            continue
        if _vmem_estimate_bytes(C, cand * P, tap_bytes, mm_bytes) <= budget_bytes:
            return cand
    return 1
    # TODO(synk): very large H*W with NB=1 would additionally need lane-axis tiling.


def _preferred_tap_dtype(mm_dtype):
    # bf16-early tap pipeline (cast -> roll -> mask) on v6e / v7x; f32 on v5e and older
    # generations that have no bf16 VPU path.
    try:
        kind = jax.devices()[0].device_kind.lower()
    except Exception:
        return jnp.float32
    if ("v6" in kind) or ("v7" in kind) or ("7x" in kind):
        return mm_dtype
    return jnp.float32


def _build_masks(H, W, C, NB, dtype):
    P = H * W
    l = jnp.arange(NB * P, dtype=jnp.int32)
    p = l % P
    row = p // W
    col = p % W
    rows = []
    for dy, dx in _TAPS:
        valid = ((row + dy >= 0) & (row + dy < H) &
                 (col + dx >= 0) & (col + dx < W))
        rows.append(valid)
    masks = jnp.stack(rows, axis=0)                                    # (9, NB*P) bool
    masks = jnp.broadcast_to(masks[:, None, :], (9, C, NB * P))
    return masks.reshape(9 * C, NB * P).astype(dtype)


def _basic_block_run(x, w1, g1, b1, w2, g2, b2, *, mm_dtype, tap_dtype):
    N, C, H, W = x.shape
    P = H * W
    CG = C // GROUP_DIM

    NB = _pick_nb(N, C, P, _dtype_bytes(tap_dtype), _dtype_bytes(mm_dtype))
    G = N // NB
    NBP = NB * P
    NBX = max(NB, 8)       # pad the stats' image axis: no K=1 / N=1 matmuls

    # lane-batched layout plumbing: (G, C, NB*P), each image's pixels contiguous on lanes
    xb = x.reshape(G, NB, C, P).transpose(0, 2, 1, 3).reshape(G, C, NBP)

    def flatten_w(w):
        # (Cout, Cin, kh, kw) -> (Cout, kh, kw, Cin) -> (Cout, 9*Cin); matches the
        # (dy, dx, cin) ordering of the in-kernel patches.  Pre-cast to the matmul dtype.
        return jnp.transpose(w, (0, 2, 3, 1)).reshape(C, 9 * C).astype(mm_dtype)

    w1f, w2f = flatten_w(w1), flatten_w(w2)
    g1c = g1.reshape(C, 1).astype(jnp.float32)
    b1c = b1.reshape(C, 1).astype(jnp.float32)
    g2c = g2.reshape(C, 1).astype(jnp.float32)
    b2c = b2.reshape(C, 1).astype(jnp.float32)

    masks = _build_masks(H, W, C, NB, tap_dtype)                       # (9C, NBP)

    img_id = jnp.arange(NBP, dtype=jnp.int32) // P
    img_ids = jnp.arange(NBX, dtype=jnp.int32)
    inv_cnt = 1.0 / float(CG * P)
    sel = (img_id[:, None] == img_ids[None, :]).astype(jnp.float32) * inv_cnt  # (NBP, NBX)
    expand = (img_ids[:, None] == img_id[None, :]).astype(jnp.float32)         # (NBX, NBP)

    cid = jnp.arange(C, dtype=jnp.int32) // CG
    mgrp = (cid[:, None] == cid[None, :]).astype(jnp.float32)
    zero = jnp.zeros_like(mgrp)
    mgrp2 = jnp.block([[mgrp, zero], [zero, mgrp]])                    # (2C, 2C)

    kernel = functools.partial(_basic_block_kernel, H=H, W=W, C=C, NB=NB,
                               mm_dtype=mm_dtype, tap_dtype=tap_dtype)

    est = _vmem_estimate_bytes(C, NBP, _dtype_bytes(tap_dtype), _dtype_bytes(mm_dtype))
    cp_kwargs = dict(dimension_semantics=("parallel",))
    if est > 12 * 1024 * 1024:
        # real rstereo resolutions: size the scoped-VMEM request explicitly (capped so it
        # is also valid on v7x's 64 MiB VMEM)
        cp_kwargs["vmem_limit_bytes"] = int(min(56 * 1024 * 1024, est + est // 2))

    out = pl.pallas_call(
        kernel,
        out_shape=jax.ShapeDtypeStruct((G, C, NBP), jnp.float32),
        grid=(G,),
        in_specs=[
            pl.BlockSpec((1, C, NBP), lambda n: (n, 0, 0)),      # x (input + residual)
            pl.BlockSpec((C, 9 * C), lambda n: (0, 0)),          # w1 (fetched once)
            pl.BlockSpec((C, 1), lambda n: (0, 0)),              # gamma1
            pl.BlockSpec((C, 1), lambda n: (0, 0)),              # beta1
            pl.BlockSpec((C, 9 * C), lambda n: (0, 0)),          # w2
            pl.BlockSpec((C, 1), lambda n: (0, 0)),              # gamma2
            pl.BlockSpec((C, 1), lambda n: (0, 0)),              # beta2
            pl.BlockSpec((9 * C, NBP), lambda n: (0, 0)),        # boundary masks
            pl.BlockSpec((NBP, NBX), lambda n: (0, 0)),          # per-image selector
            pl.BlockSpec((NBX, NBP), lambda n: (0, 0)),          # per-image expander
            pl.BlockSpec((2 * C, 2 * C), lambda n: (0, 0)),      # blockdiag group matrix
        ],
        out_specs=pl.BlockSpec((1, C, NBP), lambda n: (n, 0, 0)),
        scratch_shapes=[pltpu.VMEM((9 * C, NBP), mm_dtype)],     # im2col patches
        compiler_params=pltpu.CompilerParams(**cp_kwargs),
    )(xb, w1f, g1c, b1c, w2f, g2c, b2c, masks, sel, expand, mgrp2)

    return out.reshape(G, C, NB, P).transpose(0, 2, 1, 3).reshape(N, C, H, W)


def basic_block_forward(x, w1, g1, b1, w2, g2, b2, *, mm_dtype=jnp.bfloat16):
    """x: (N, C, H, W) float32 (NCHW, matching the PyTorch module).
       w1, w2: (C, C, 3, 3) float32 conv weights (OIHW, matching nn.Conv2d).
       g*, b*: (C,) GroupNorm affine parameters."""
    N, C, H, W = x.shape
    assert C % GROUP_DIM == 0

    tap_pref = _preferred_tap_dtype(mm_dtype)
    if jnp.dtype(tap_pref) != jnp.dtype(jnp.float32):
        try:
            out = _basic_block_run(x, w1, g1, b1, w2, g2, b2,
                                   mm_dtype=mm_dtype, tap_dtype=tap_pref)
            return jax.block_until_ready(out)
        except Exception:
            pass  # e.g. bf16 lane-roll not supported by the local Mosaic -> f32 taps
    return _basic_block_run(x, w1, g1, b1, w2, g2, b2,
                            mm_dtype=mm_dtype, tap_dtype=jnp.float32)


def _reference_forward(x, w1, g1, b1, w2, g2, b2):
    """Pure-JAX (f32) reference matching the PyTorch BasicBlock (stride=1, no downsample)."""
    def conv(x, w):
        return lax.conv_general_dilated(
            x, w, (1, 1), ((1, 1), (1, 1)),
            dimension_numbers=("NCHW", "OIHW", "NCHW"))

    def gn(x, gamma, beta):
        N, C, H, W = x.shape
        xg = x.reshape(N, GROUP_DIM, C // GROUP_DIM, H, W)
        mean = xg.mean(axis=(2, 3, 4), keepdims=True)
        var = ((xg - mean) ** 2).mean(axis=(2, 3, 4), keepdims=True)
        y = ((xg - mean) / jnp.sqrt(var + EPS)).reshape(N, C, H, W)
        return y * gamma.reshape(1, C, 1, 1) + beta.reshape(1, C, 1, 1)

    out = jax.nn.relu(gn(conv(x, w1), g1, b1))
    out = gn(conv(out, w2), g2, b2)
    return jax.nn.relu(out + x)


if __name__ == "__main__":
    # small shapes consistent with the module: inplanes = planes = 16 (divisible by group_dim=8)
    N, C, H, W = 2, 16, 16, 16

    key = jax.random.PRNGKey(0)
    kx, kw1, kw2, kg1, kb1, kg2, kb2 = jax.random.split(key, 7)

    x = jax.random.normal(kx, (N, C, H, W), jnp.float32)
    w1 = jax.random.normal(kw1, (C, C, 3, 3), jnp.float32) * 0.1    # OIHW
    w2 = jax.random.normal(kw2, (C, C, 3, 3), jnp.float32) * 0.1
    g1 = 1.0 + 0.1 * jax.random.normal(kg1, (C,), jnp.float32)
    b1 = 0.1 * jax.random.normal(kb1, (C,), jnp.float32)
    g2 = 1.0 + 0.1 * jax.random.normal(kg2, (C,), jnp.float32)
    b2 = 0.1 * jax.random.normal(kb2, (C,), jnp.float32)

    out = basic_block_forward(x, w1, g1, b1, w2, g2, b2)
    out = jax.block_until_ready(out)

    ref = _reference_forward(x, w1, g1, b1, w2, g2, b2)
    assert out.shape == (N, C, H, W)
    # bf16 conv operands (f32 accumulate) vs. f32 reference -> bf16-level tolerance
    assert jnp.allclose(out, ref, rtol=2e-2, atol=2e-2), "mismatch vs JAX reference"

    print("KERNEL_OK")
</pallas_src>

<mosaic_0001>
module attributes {stable_mosaic.version = 11 : i64} {
  func.func @_basic_block_kernel(%arg0: i32, %arg1: memref<1x16x256xf32, #tpu.memory_space<vmem>>, %arg2: memref<16x144xbf16, #tpu.memory_space<vmem>>, %arg3: memref<16x1xf32, #tpu.memory_space<vmem>>, %arg4: memref<16x1xf32, #tpu.memory_space<vmem>>, %arg5: memref<16x144xbf16, #tpu.memory_space<vmem>>, %arg6: memref<16x1xf32, #tpu.memory_space<vmem>>, %arg7: memref<16x1xf32, #tpu.memory_space<vmem>>, %arg8: memref<144x256xf32, #tpu.memory_space<vmem>>, %arg9: memref<256x8xf32, #tpu.memory_space<vmem>>, %arg10: memref<8x256xf32, #tpu.memory_space<vmem>>, %arg11: memref<32x32xf32, #tpu.memory_space<vmem>>, %arg12: memref<1x16x256xf32, #tpu.memory_space<vmem>>, %arg13: memref<144x256xbf16, #tpu.memory_space<vmem>>) attributes {dimension_semantics = [#tpu.dimension_semantics<parallel>], iteration_bounds = array<i64: 2>, scalar_prefetch = 0 : i64, scratch_operands = 1 : i64, tpu.core_type = #tpu.core_type<tc>, window_params = [{transform_indices = @transform_0, window_bounds = array<i64: 1, 16, 256>}, {pipeline_mode = #tpu.pipeline_mode<synchronous>, transform_indices = @transform_1, window_bounds = array<i64: 16, 144>}, {pipeline_mode = #tpu.pipeline_mode<synchronous>, transform_indices = @transform_2, window_bounds = array<i64: 16, 1>}, {pipeline_mode = #tpu.pipeline_mode<synchronous>, transform_indices = @transform_3, window_bounds = array<i64: 16, 1>}, {pipeline_mode = #tpu.pipeline_mode<synchronous>, transform_indices = @transform_4, window_bounds = array<i64: 16, 144>}, {pipeline_mode = #tpu.pipeline_mode<synchronous>, transform_indices = @transform_5, window_bounds = array<i64: 16, 1>}, {pipeline_mode = #tpu.pipeline_mode<synchronous>, transform_indices = @transform_6, window_bounds = array<i64: 16, 1>}, {pipeline_mode = #tpu.pipeline_mode<synchronous>, transform_indices = @transform_7, window_bounds = array<i64: 144, 256>}, {pipeline_mode = #tpu.pipeline_mode<synchronous>, transform_indices = @transform_8, window_bounds = array<i64: 256, 8>}, {pipeline_mode = #tpu.pipeline_mode<synchronous>, transform_indices = @transform_9, window_bounds = array<i64: 8, 256>}, {pipeline_mode = #tpu.pipeline_mode<synchronous>, transform_indices = @transform_10, window_bounds = array<i64: 32, 32>}, {transform_indices = @transform_11, window_bounds = array<i64: 1, 16, 256>}]} {
    %c0 = arith.constant 0 : index
    %c0_0 = arith.constant 0 : index
    %0 = vector.load %arg2[%c0, %c0_0] : memref<16x144xbf16, #tpu.memory_space<vmem>>, vector<16x144xbf16>
    %c0_1 = arith.constant 0 : index
    %c0_2 = arith.constant 0 : index
    %1 = vector.load %arg5[%c0_1, %c0_2] : memref<16x144xbf16, #tpu.memory_space<vmem>>, vector<16x144xbf16>
    %c0_3 = arith.constant 0 : index
    %c0_4 = arith.constant 0 : index
    %2 = vector.load %arg9[%c0_3, %c0_4] : memref<256x8xf32, #tpu.memory_space<vmem>>, vector<256x8xf32>
    %c0_5 = arith.constant 0 : index
    %c0_6 = arith.constant 0 : index
    %3 = vector.load %arg10[%c0_5, %c0_6] : memref<8x256xf32, #tpu.memory_space<vmem>>, vector<8x256xf32>
    %c0_7 = arith.constant 0 : index
    %c0_8 = arith.constant 0 : index
    %4 = vector.load %arg11[%c0_7, %c0_8] : memref<32x32xf32, #tpu.memory_space<vmem>>, vector<32x32xf32>
    %c0_9 = arith.constant 0 : index
    %c0_10 = arith.constant 0 : index
    %c0_11 = arith.constant 0 : index
    %5 = vector.load %arg1[%c0_9, %c0_10, %c0_11] : memref<1x16x256xf32, #tpu.memory_space<vmem>>, vector<1x16x256xf32>
    %6 = vector.shape_cast %5 : vector<1x16x256xf32> to vector<16x256xf32>
    %c17_i32 = arith.constant 17 : i32
    %7 = tpu.dynamic_rotate %6 by %c17_i32 dim 1 : vector<16x256xf32>, i32 -> vector<16x256xf32>
    %c0_12 = arith.constant 0 : index
    %c0_13 = arith.constant 0 : index
    %8 = vector.load %arg8[%c0_12, %c0_13] : memref<144x256xf32, #tpu.memory_space<vmem>>, vector<16x256xf32>
    %9 = arith.mulf %7, %8 : vector<16x256xf32>
    %10 = arith.truncf %9 : vector<16x256xf32> to vector<16x256xbf16>
    %c0_14 = arith.constant 0 : index
    %c0_15 = arith.constant 0 : index
    %11 = vector.load %arg13[%c0_14, %c0_15] : memref<144x256xbf16, #tpu.memory_space<vmem>>, vector<16x256xbf16>
    tpu.vector_store %arg13[%c0_14, %c0_15], %10 {strides = array<i32>} : memref<144x256xbf16, #tpu.memory_space<vmem>>, vector<16x256xbf16>,
    %c16_i32 = arith.constant 16 : i32
    %12 = tpu.dynamic_rotate %6 by %c16_i32 dim 1 : vector<16x256xf32>, i32 -> vector<16x256xf32>
    %c16 = arith.constant 16 : index
    %c0_16 = arith.constant 0 : index
    %13 = vector.load %arg8[%c16, %c0_16] : memref<144x256xf32, #tpu.memory_space<vmem>>, vector<16x256xf32>
    %14 = arith.mulf %12, %13 : vector<16x256xf32>
    %15 = arith.truncf %14 : vector<16x256xf32> to vector<16x256xbf16>
    %c16_17 = arith.constant 16 : index
    %c0_18 = arith.constant 0 : index
    %16 = vector.load %arg13[%c16_17, %c0_18] : memref<144x256xbf16, #tpu.memory_space<vmem>>, vector<16x256xbf16>
    tpu.vector_store %arg13[%c16_17, %c0_18], %15 {strides = array<i32>} : memref<144x256xbf16, #tpu.memory_space<vmem>>, vector<16x256xbf16>,
    %c15_i32 = arith.constant 15 : i32
    %17 = tpu.dynamic_rotate %6 by %c15_i32 dim 1 : vector<16x256xf32>, i32 -> vector<16x256xf32>
    %c32 = arith.constant 32 : index
    %c0_19 = arith.constant 0 : index
    %18 = vector.load %arg8[%c32, %c0_19] : memref<144x256xf32, #tpu.memory_space<vmem>>, vector<16x256xf32>
    %19 = arith.mulf %17, %18 : vector<16x256xf32>
    %20 = arith.truncf %19 : vector<16x256xf32> to vector<16x256xbf16>
    %c32_20 = arith.constant 32 : index
    %c0_21 = arith.constant 0 : index
    %21 = vector.load %arg13[%c32_20, %c0_21] : memref<144x256xbf16, #tpu.memory_space<vmem>>, vector<16x256xbf16>
    tpu.vector_store %arg13[%c32_20, %c0_21], %20 {strides = array<i32>} : memref<144x256xbf16, #tpu.memory_space<vmem>>, vector<16x256xbf16>,
    %c1_i32 = arith.constant 1 : i32
    %22 = tpu.dynamic_rotate %6 by %c1_i32 dim 1 : vector<16x256xf32>, i32 -> vector<16x256xf32>
    %c48 = arith.constant 48 : index
    %c0_22 = arith.constant 0 : index
    %23 = vector.load %arg8[%c48, %c0_22] : memref<144x256xf32, #tpu.memory_space<vmem>>, vector<16x256xf32>
    %24 = arith.mulf %22, %23 : vector<16x256xf32>
    %25 = arith.truncf %24 : vector<16x256xf32> to vector<16x256xbf16>
    %c48_23 = arith.constant 48 : index
    %c0_24 = arith.constant 0 : index
    %26 = vector.load %arg13[%c48_23, %c0_24] : memref<144x256xbf16, #tpu.memory_space<vmem>>, vector<16x256xbf16>
    tpu.vector_store %arg13[%c48_23, %c0_24], %25 {strides = array<i32>} : memref<144x256xbf16, #tpu.memory_space<vmem>>, vector<16x256xbf16>,
    %c64 = arith.constant 64 : index
    %c0_25 = arith.constant 0 : index
    %27 = vector.load %arg8[%c64, %c0_25] : memref<144x256xf32, #tpu.memory_space<vmem>>, vector<16x256xf32>
    %28 = arith.mulf %6, %27 : vector<16x256xf32>
    %29 = arith.truncf %28 : vector<16x256xf32> to vector<16x256xbf16>
    %c64_26 = arith.constant 64 : index
    %c0_27 = arith.constant 0 : index
    %30 = vector.load %arg13[%c64_26, %c0_27] : memref<144x256xbf16, #tpu.memory_space<vmem>>, vector<16x256xbf16>
    tpu.vector_store %arg13[%c64_26, %c0_27], %29 {strides = array<i32>} : memref<144x256xbf16, #tpu.memory_space<vmem>>, vector<16x256xbf16>,
    %c255_i32 = arith.constant 255 : i32
    %31 = tpu.dynamic_rotate %6 by %c255_i32 dim 1 : vector<16x256xf32>, i32 -> vector<16x256xf32>
    %c80 = arith.constant 80 : index
    %c0_28 = arith.constant 0 : index
    %32 = vector.load %arg8[%c80, %c0_28] : memref<144x256xf32, #tpu.memory_space<vmem>>, vector<16x256xf32>
    %33 = arith.mulf %31, %32 : vector<16x256xf32>
    %34 = arith.truncf %33 : vector<16x256xf32> to vector<16x256xbf16>
    %c80_29 = arith.constant 80 : index
    %c0_30 = arith.constant 0 : index
    %35 = vector.load %arg13[%c80_29, %c0_30] : memref<144x256xbf16, #tpu.memory_space<vmem>>, vector<16x256xbf16>
    tpu.vector_store %arg13[%c80_29, %c0_30], %34 {strides = array<i32>} : memref<144x256xbf16, #tpu.memory_space<vmem>>, vector<16x256xbf16>,
    %c241_i32 = arith.constant 241 : i32
    %36 = tpu.dynamic_rotate %6 by %c241_i32 dim 1 : vector<16x256xf32>, i32 -> vector<16x256xf32>
    %c96 = arith.constant 96 : index
    %c0_31 = arith.constant 0 : index
    %37 = vector.load %arg8[%c96, %c0_31] : memref<144x256xf32, #tpu.memory_space<vmem>>, vector<16x256xf32>
    %38 = arith.mulf %36, %37 : vector<16x256xf32>
    %39 = arith.truncf %38 : vector<16x256xf32> to vector<16x256xbf16>
    %c96_32 = arith.constant 96 : index
    %c0_33 = arith.constant 0 : index
    %40 = vector.load %arg13[%c96_32, %c0_33] : memref<144x256xbf16, #tpu.memory_space<vmem>>, vector<16x256xbf16>
    tpu.vector_store %arg13[%c96_32, %c0_33], %39 {strides = array<i32>} : memref<144x256xbf16, #tpu.memory_space<vmem>>, vector<16x256xbf16>,
    %c240_i32 = arith.constant 240 : i32
    %41 = tpu.dynamic_rotate %6 by %c240_i32 dim 1 : vector<16x256xf32>, i32 -> vector<16x256xf32>
    %c112 = arith.constant 112 : index
    %c0_34 = arith.constant 0 : index
    %42 = vector.load %arg8[%c112, %c0_34] : memref<144x256xf32, #tpu.memory_space<vmem>>, vector<16x256xf32>
    %43 = arith.mulf %41, %42 : vector<16x256xf32>
    %44 = arith.truncf %43 : vector<16x256xf32> to vector<16x256xbf16>
    %c112_35 = arith.constant 112 : index
    %c0_36 = arith.constant 0 : index
    %45 = vector.load %arg13[%c112_35, %c0_36] : memref<144x256xbf16, #tpu.memory_space<vmem>>, vector<16x256xbf16>
    tpu.vector_store %arg13[%c112_35, %c0_36], %44 {strides = array<i32>} : memref<144x256xbf16, #tpu.memory_space<vmem>>, vector<16x256xbf16>,
    %c239_i32 = arith.constant 239 : i32
    %46 = tpu.dynamic_rotate %6 by %c239_i32 dim 1 : vector<16x256xf32>, i32 -> vector<16x256xf32>
    %c128 = arith.constant 128 : index
    %c0_37 = arith.constant 0 : index
    %47 = vector.load %arg8[%c128, %c0_37] : memref<144x256xf32, #tpu.memory_space<vmem>>, vector<16x256xf32>
    %48 = arith.mulf %46, %47 : vector<16x256xf32>
    %49 = arith.truncf %48 : vector<16x256xf32> to vector<16x256xbf16>
    %c128_38 = arith.constant 128 : index
    %c0_39 = arith.constant 0 : index
    %50 = vector.load %arg13[%c128_38, %c0_39] : memref<144x256xbf16, #tpu.memory_space<vmem>>, vector<16x256xbf16>
    tpu.vector_store %arg13[%c128_38, %c0_39], %49 {strides = array<i32>} : memref<144x256xbf16, #tpu.memory_space<vmem>>, vector<16x256xbf16>,
    %c0_40 = arith.constant 0 : index
    %c0_41 = arith.constant 0 : index
    %51 = vector.load %arg13[%c0_40, %c0_41] : memref<144x256xbf16, #tpu.memory_space<vmem>>, vector<144x256xbf16>
    %cst = arith.constant dense<0.000000e+00> : vector<16x256xf32>
    %52 = tpu.matmul %0, %51, %cst {dimension_numbers = #tpu.dot_dimension_numbers<[1], [0], [0], [1], [0, 0, 1, 1], [], []>} : vector<16x144xbf16>, vector<144x256xbf16>, vector<16x256xf32> -> vector<16x256xf32>
    %c0_42 = arith.constant 0 : index
    %c0_43 = arith.constant 0 : index
    %53 = vector.load %arg3[%c0_42, %c0_43] : memref<16x1xf32, #tpu.memory_space<vmem>>, vector<16x1xf32>
    %c0_44 = arith.constant 0 : index
    %c0_45 = arith.constant 0 : index
    %54 = vector.load %arg4[%c0_44, %c0_45] : memref<16x1xf32, #tpu.memory_space<vmem>>, vector<16x1xf32>
    %cst_46 = arith.constant dense<0.000000e+00> : vector<16x8xf32>
    %55 = tpu.matmul %52, %2, %cst_46 {dimension_numbers = #tpu.dot_dimension_numbers<[1], [0], [0], [1], [0, 0, 1, 1], [], []>} : vector<16x256xf32>, vector<256x8xf32>, vector<16x8xf32> -> vector<16x8xf32>
    %56 = arith.mulf %52, %52 : vector<16x256xf32>
    %cst_47 = arith.constant dense<0.000000e+00> : vector<16x8xf32>
    %57 = tpu.matmul %56, %2, %cst_47 {dimension_numbers = #tpu.dot_dimension_numbers<[1], [0], [0], [1], [0, 0, 1, 1], [], []>} : vector<16x256xf32>, vector<256x8xf32>, vector<16x8xf32> -> vector<16x8xf32>
    %58 = tpu.concatenate %55, %57 in 0 : vector<16x8xf32>, vector<16x8xf32> -> vector<32x8xf32>
    %cst_48 = arith.constant dense<0.000000e+00> : vector<32x8xf32>
    %59 = tpu.matmul %4, %58, %cst_48 {dimension_numbers = #tpu.dot_dimension_numbers<[1], [0], [0], [1], [0, 0, 1, 1], [], []>} : vector<32x32xf32>, vector<32x8xf32>, vector<32x8xf32> -> vector<32x8xf32>
    %60 = vector.extract_strided_slice %59 {offsets = [0, 0], sizes = [16, 8], strides = [1, 1]} : vector<32x8xf32> to vector<16x8xf32>
    %61 = vector.extract_strided_slice %59 {offsets = [16, 0], sizes = [16, 8], strides = [1, 1]} : vector<32x8xf32> to vector<16x8xf32>
    %62 = arith.mulf %60, %60 : vector<16x8xf32>
    %63 = arith.subf %61, %62 : vector<16x8xf32>
    %cst_49 = arith.constant 0.000000e+00 : f32
    %64 = vector.broadcast %cst_49 : f32 to vector<16x8xf32>
    %65 = arith.maximumf %63, %64 : vector<16x8xf32>
    %cst_50 = arith.constant 9.99999974E-6 : f32
    %66 = vector.broadcast %cst_50 : f32 to vector<16x8xf32>
    %67 = arith.addf %65, %66 : vector<16x8xf32>
    %68 = math.rsqrt %67 : vector<16x8xf32>
    %69 = vector.broadcast %53 : vector<16x1xf32> to vector<16x8xf32>
    %70 = arith.mulf %68, %69 : vector<16x8xf32>
    %71 = arith.mulf %60, %70 : vector<16x8xf32>
    %72 = vector.broadcast %54 : vector<16x1xf32> to vector<16x8xf32>
    %73 = arith.subf %72, %71 : vector<16x8xf32>
    %74 = tpu.concatenate %70, %73 in 0 : vector<16x8xf32>, vector<16x8xf32> -> vector<32x8xf32>
    %cst_51 = arith.constant dense<0.000000e+00> : vector<32x256xf32>
    %75 = tpu.matmul %74, %3, %cst_51 {dimension_numbers = #tpu.dot_dimension_numbers<[1], [0], [0], [1], [0, 0, 1, 1], [], []>} : vector<32x8xf32>, vector<8x256xf32>, vector<32x256xf32> -> vector<32x256xf32>
    %76 = vector.extract_strided_slice %75 {offsets = [0, 0], sizes = [16, 256], strides = [1, 1]} : vector<32x256xf32> to vector<16x256xf32>
    %77 = arith.mulf %52, %76 : vector<16x256xf32>
    %78 = vector.extract_strided_slice %75 {offsets = [16, 0], sizes = [16, 256], strides = [1, 1]} : vector<32x256xf32> to vector<16x256xf32>
    %79 = arith.addf %77, %78 : vector<16x256xf32>
    %cst_52 = arith.constant 0.000000e+00 : f32
    %80 = vector.broadcast %cst_52 : f32 to vector<16x256xf32>
    %81 = arith.maximumf %79, %80 : vector<16x256xf32>
    %c17_i32_53 = arith.constant 17 : i32
    %82 = tpu.dynamic_rotate %81 by %c17_i32_53 dim 1 : vector<16x256xf32>, i32 -> vector<16x256xf32>
    %c0_54 = arith.constant 0 : index
    %c0_55 = arith.constant 0 : index
    %83 = vector.load %arg8[%c0_54, %c0_55] : memref<144x256xf32, #tpu.memory_space<vmem>>, vector<16x256xf32>
    %84 = arith.mulf %82, %83 : vector<16x256xf32>
    %85 = arith.truncf %84 : vector<16x256xf32> to vector<16x256xbf16>
    %c0_56 = arith.constant 0 : index
    %c0_57 = arith.constant 0 : index
    %86 = vector.load %arg13[%c0_56, %c0_57] : memref<144x256xbf16, #tpu.memory_space<vmem>>, vector<16x256xbf16>
    tpu.vector_store %arg13[%c0_56, %c0_57], %85 {strides = array<i32>} : memref<144x256xbf16, #tpu.memory_space<vmem>>, vector<16x256xbf16>,
    %c16_i32_58 = arith.constant 16 : i32
    %87 = tpu.dynamic_rotate %81 by %c16_i32_58 dim 1 : vector<16x256xf32>, i32 -> vector<16x256xf32>
    %c16_59 = arith.constant 16 : index
    %c0_60 = arith.constant 0 : index
    %88 = vector.load %arg8[%c16_59, %c0_60] : memref<144x256xf32, #tpu.memory_space<vmem>>, vector<16x256xf32>
    %89 = arith.mulf %87, %88 : vector<16x256xf32>
    %90 = arith.truncf %89 : vector<16x256xf32> to vector<16x256xbf16>
    %c16_61 = arith.constant 16 : index
    %c0_62 = arith.constant 0 : index
    %91 = vector.load %arg13[%c16_61, %c0_62] : memref<144x256xbf16, #tpu.memory_space<vmem>>, vector<16x256xbf16>
    tpu.vector_store %arg13[%c16_61, %c0_62], %90 {strides = array<i32>} : memref<144x256xbf16, #tpu.memory_space<vmem>>, vector<16x256xbf16>,
    %c15_i32_63 = arith.constant 15 : i32
    %92 = tpu.dynamic_rotate %81 by %c15_i32_63 dim 1 : vector<16x256xf32>, i32 -> vector<16x256xf32>
    %c32_64 = arith.constant 32 : index
    %c0_65 = arith.constant 0 : index
    %93 = vector.load %arg8[%c32_64, %c0_65] : memref<144x256xf32, #tpu.memory_space<vmem>>, vector<16x256xf32>
    %94 = arith.mulf %92, %93 : vector<16x256xf32>
    %95 = arith.truncf %94 : vector<16x256xf32> to vector<16x256xbf16>
    %c32_66 = arith.constant 32 : index
    %c0_67 = arith.constant 0 : index
    %96 = vector.load %arg13[%c32_66, %c0_67] : memref<144x256xbf16, #tpu.memory_space<vmem>>, vector<16x256xbf16>
    tpu.vector_store %arg13[%c32_66, %c0_67], %95 {strides = array<i32>} : memref<144x256xbf16, #tpu.memory_space<vmem>>, vector<16x256xbf16>,
    %c1_i32_68 = arith.constant 1 : i32
    %97 = tpu.dynamic_rotate %81 by %c1_i32_68 dim 1 : vector<16x256xf32>, i32 -> vector<16x256xf32>
    %c48_69 = arith.constant 48 : index
    %c0_70 = arith.constant 0 : index
    %98 = vector.load %arg8[%c48_69, %c0_70] : memref<144x256xf32, #tpu.memory_space<vmem>>, vector<16x256xf32>
    %99 = arith.mulf %97, %98 : vector<16x256xf32>
    %100 = arith.truncf %99 : vector<16x256xf32> to vector<16x256xbf16>
    %c48_71 = arith.constant 48 : index
    %c0_72 = arith.constant 0 : index
    %101 = vector.load %arg13[%c48_71, %c0_72] : memref<144x256xbf16, #tpu.memory_space<vmem>>, vector<16x256xbf16>
    tpu.vector_store %arg13[%c48_71, %c0_72], %100 {strides = array<i32>} : memref<144x256xbf16, #tpu.memory_space<vmem>>, vector<16x256xbf16>,
    %c64_73 = arith.constant 64 : index
    %c0_74 = arith.constant 0 : index
    %102 = vector.load %arg8[%c64_73, %c0_74] : memref<144x256xf32, #tpu.memory_space<vmem>>, vector<16x256xf32>
    %103 = arith.mulf %81, %102 : vector<16x256xf32>
    %104 = arith.truncf %103 : vector<16x256xf32> to vector<16x256xbf16>
    %c64_75 = arith.constant 64 : index
    %c0_76 = arith.constant 0 : index
    %105 = vector.load %arg13[%c64_75, %c0_76] : memref<144x256xbf16, #tpu.memory_space<vmem>>, vector<16x256xbf16>
    tpu.vector_store %arg13[%c64_75, %c0_76], %104 {strides = array<i32>} : memref<144x256xbf16, #tpu.memory_space<vmem>>, vector<16x256xbf16>,
    %c255_i32_77 = arith.constant 255 : i32
    %106 = tpu.dynamic_rotate %81 by %c255_i32_77 dim 1 : vector<16x256xf32>, i32 -> vector<16x256xf32>
    %c80_78 = arith.constant 80 : index
    %c0_79 = arith.constant 0 : index
    %107 = vector.load %arg8[%c80_78, %c0_79] : memref<144x256xf32, #tpu.memory_space<vmem>>, vector<16x256xf32>
    %108 = arith.mulf %106, %107 : vector<16x256xf32>
    %109 = arith.truncf %108 : vector<16x256xf32> to vector<16x256xbf16>
    %c80_80 = arith.constant 80 : index
    %c0_81 = arith.constant 0 : index
    %110 = vector.load %arg13[%c80_80, %c0_81] : memref<144x256xbf16, #tpu.memory_space<vmem>>, vector<16x256xbf16>
    tpu.vector_store %arg13[%c80_80, %c0_81], %109 {strides = array<i32>} : memref<144x256xbf16, #tpu.memory_space<vmem>>, vector<16x256xbf16>,
    %c241_i32_82 = arith.constant 241 : i32
    %111 = tpu.dynamic_rotate %81 by %c241_i32_82 dim 1 : vector<16x256xf32>, i32 -> vector<16x256xf32>
    %c96_83 = arith.constant 96 : index
    %c0_84 = arith.constant 0 : index
    %112 = vector.load %arg8[%c96_83, %c0_84] : memref<144x256xf32, #tpu.memory_space<vmem>>, vector<16x256xf32>
    %113 = arith.mulf %111, %112 : vector<16x256xf32>
    %114 = arith.truncf %113 : vector<16x256xf32> to vector<16x256xbf16>
    %c96_85 = arith.constant 96 : index
    %c0_86 = arith.constant 0 : index
    %115 = vector.load %arg13[%c96_85, %c0_86] : memref<144x256xbf16, #tpu.memory_space<vmem>>, vector<16x256xbf16>
    tpu.vector_store %arg13[%c96_85, %c0_86], %114 {strides = array<i32>} : memref<144x256xbf16, #tpu.memory_space<vmem>>, vector<16x256xbf16>,
    %c240_i32_87 = arith.constant 240 : i32
    %116 = tpu.dynamic_rotate %81 by %c240_i32_87 dim 1 : vector<16x256xf32>, i32 -> vector<16x256xf32>
    %c112_88 = arith.constant 112 : index
    %c0_89 = arith.constant 0 : index
    %117 = vector.load %arg8[%c112_88, %c0_89] : memref<144x256xf32, #tpu.memory_space<vmem>>, vector<16x256xf32>
    %118 = arith.mulf %116, %117 : vector<16x256xf32>
    %119 = arith.truncf %118 : vector<16x256xf32> to vector<16x256xbf16>
    %c112_90 = arith.constant 112 : index
    %c0_91 = arith.constant 0 : index
    %120 = vector.load %arg13[%c112_90, %c0_91] : memref<144x256xbf16, #tpu.memory_space<vmem>>, vector<16x256xbf16>
    tpu.vector_store %arg13[%c112_90, %c0_91], %119 {strides = array<i32>} : memref<144x256xbf16, #tpu.memory_space<vmem>>, vector<16x256xbf16>,
    %c239_i32_92 = arith.constant 239 : i32
    %121 = tpu.dynamic_rotate %81 by %c239_i32_92 dim 1 : vector<16x256xf32>, i32 -> vector<16x256xf32>
    %c128_93 = arith.constant 128 : index
    %c0_94 = arith.constant 0 : index
    %122 = vector.load %arg8[%c128_93, %c0_94] : memref<144x256xf32, #tpu.memory_space<vmem>>, vector<16x256xf32>
    %123 = arith.mulf %121, %122 : vector<16x256xf32>
    %124 = arith.truncf %123 : vector<16x256xf32> to vector<16x256xbf16>
    %c128_95 = arith.constant 128 : index
    %c0_96 = arith.constant 0 : index
    %125 = vector.load %arg13[%c128_95, %c0_96] : memref<144x256xbf16, #tpu.memory_space<vmem>>, vector<16x256xbf16>
    tpu.vector_store %arg13[%c128_95, %c0_96], %124 {strides = array<i32>} : memref<144x256xbf16, #tpu.memory_space<vmem>>, vector<16x256xbf16>,
    %c0_97 = arith.constant 0 : index
    %c0_98 = arith.constant 0 : index
    %126 = vector.load %arg13[%c0_97, %c0_98] : memref<144x256xbf16, #tpu.memory_space<vmem>>, vector<144x256xbf16>
    %cst_99 = arith.constant dense<0.000000e+00> : vector<16x256xf32>
    %127 = tpu.matmul %1, %126, %cst_99 {dimension_numbers = #tpu.dot_dimension_numbers<[1], [0], [0], [1], [0, 0, 1, 1], [], []>} : vector<16x144xbf16>, vector<144x256xbf16>, vector<16x256xf32> -> vector<16x256xf32>
    %c0_100 = arith.constant 0 : index
    %c0_101 = arith.constant 0 : index
    %128 = vector.load %arg6[%c0_100, %c0_101] : memref<16x1xf32, #tpu.memory_space<vmem>>, vector<16x1xf32>
    %c0_102 = arith.constant 0 : index
    %c0_103 = arith.constant 0 : index
    %129 = vector.load %arg7[%c0_102, %c0_103] : memref<16x1xf32, #tpu.memory_space<vmem>>, vector<16x1xf32>
    %cst_104 = arith.constant dense<0.000000e+00> : vector<16x8xf32>
    %130 = tpu.matmul %127, %2, %cst_104 {dimension_numbers = #tpu.dot_dimension_numbers<[1], [0], [0], [1], [0, 0, 1, 1], [], []>} : vector<16x256xf32>, vector<256x8xf32>, vector<16x8xf32> -> vector<16x8xf32>
    %131 = arith.mulf %127, %127 : vector<16x256xf32>
    %cst_105 = arith.constant dense<0.000000e+00> : vector<16x8xf32>
    %132 = tpu.matmul %131, %2, %cst_105 {dimension_numbers = #tpu.dot_dimension_numbers<[1], [0], [0], [1], [0, 0, 1, 1], [], []>} : vector<16x256xf32>, vector<256x8xf32>, vector<16x8xf32> -> vector<16x8xf32>
    %133 = tpu.concatenate %130, %132 in 0 : vector<16x8xf32>, vector<16x8xf32> -> vector<32x8xf32>
    %cst_106 = arith.constant dense<0.000000e+00> : vector<32x8xf32>
    %134 = tpu.matmul %4, %133, %cst_106 {dimension_numbers = #tpu.dot_dimension_numbers<[1], [0], [0], [1], [0, 0, 1, 1], [], []>} : vector<32x32xf32>, vector<32x8xf32>, vector<32x8xf32> -> vector<32x8xf32>
    %135 = vector.extract_strided_slice %134 {offsets = [0, 0], sizes = [16, 8], strides = [1, 1]} : vector<32x8xf32> to vector<16x8xf32>
    %136 = vector.extract_strided_slice %134 {offsets = [16, 0], sizes = [16, 8], strides = [1, 1]} : vector<32x8xf32> to vector<16x8xf32>
    %137 = arith.mulf %135, %135 : vector<16x8xf32>
    %138 = arith.subf %136, %137 : vector<16x8xf32>
    %cst_107 = arith.constant 0.000000e+00 : f32
    %139 = vector.broadcast %cst_107 : f32 to vector<16x8xf32>
    %140 = arith.maximumf %138, %139 : vector<16x8xf32>
    %cst_108 = arith.constant 9.99999974E-6 : f32
    %141 = vector.broadcast %cst_108 : f32 to vector<16x8xf32>
    %142 = arith.addf %140, %141 : vector<16x8xf32>
    %143 = math.rsqrt %142 : vector<16x8xf32>
    %144 = vector.broadcast %128 : vector<16x1xf32> to vector<16x8xf32>
    %145 = arith.mulf %143, %144 : vector<16x8xf32>
    %146 = arith.mulf %135, %145 : vector<16x8xf32>
    %147 = vector.broadcast %129 : vector<16x1xf32> to vector<16x8xf32>
    %148 = arith.subf %147, %146 : vector<16x8xf32>
    %149 = tpu.concatenate %145, %148 in 0 : vector<16x8xf32>, vector<16x8xf32> -> vector<32x8xf32>
    %cst_109 = arith.constant dense<0.000000e+00> : vector<32x256xf32>
    %150 = tpu.matmul %149, %3, %cst_109 {dimension_numbers = #tpu.dot_dimension_numbers<[1], [0], [0], [1], [0, 0, 1, 1], [], []>} : vector<32x8xf32>, vector<8x256xf32>, vector<32x256xf32> -> vector<32x256xf32>
    %151 = vector.extract_strided_slice %150 {offsets = [0, 0], sizes = [16, 256], strides = [1, 1]} : vector<32x256xf32> to vector<16x256xf32>
    %152 = arith.mulf %127, %151 : vector<16x256xf32>
    %153 = vector.extract_strided_slice %150 {offsets = [16, 0], sizes = [16, 256], strides = [1, 1]} : vector<32x256xf32> to vector<16x256xf32>
    %154 = arith.addf %152, %153 : vector<16x256xf32>
    %c0_110 = arith.constant 0 : index
    %c0_111 = arith.constant 0 : index
    %c0_112 = arith.constant 0 : index
    %155 = vector.load %arg1[%c0_110, %c0_111, %c0_112] : memref<1x16x256xf32, #tpu.memory_space<vmem>>, vector<1x16x256xf32>
    %156 = vector.shape_cast %155 : vector<1x16x256xf32> to vector<16x256xf32>
    %157 = arith.addf %154, %156 : vector<16x256xf32>
    %cst_113 = arith.constant 0.000000e+00 : f32
    %158 = vector.broadcast %cst_113 : f32 to vector<16x256xf32>
    %159 = arith.maximumf %157, %158 : vector<16x256xf32>
    %c0_114 = arith.constant 0 : index
    %c0_115 = arith.constant 0 : index
    %c0_116 = arith.constant 0 : index
    %160 = vector.load %arg12[%c0_114, %c0_115, %c0_116] : memref<1x16x256xf32, #tpu.memory_space<vmem>>, vector<1x16x256xf32>
    %161 = vector.shape_cast %160 : vector<1x16x256xf32> to vector<16x256xf32>
    %162 = vector.shape_cast %159 : vector<16x256xf32> to vector<1x16x256xf32>
    tpu.vector_store %arg12[%c0_114, %c0_115, %c0_116], %162 {strides = array<i32>} : memref<1x16x256xf32, #tpu.memory_space<vmem>>, vector<1x16x256xf32>,
    return
  }
  func.func @transform_0(%arg0: i32) -> (i32, i32, i32) {
    %c0_i32 = arith.constant 0 : i32
    %c0_i32_0 = arith.constant 0 : i32
    %c0_i32_1 = arith.constant 0 : i32
    return %arg0, %c0_i32, %c0_i32_0 : i32, i32, i32
  }
  func.func @transform_1(%arg0: i32) -> (i32, i32) {
    %c0_i32 = arith.constant 0 : i32
    %c0_i32_0 = arith.constant 0 : i32
    %c0_i32_1 = arith.constant 0 : i32
    return %c0_i32, %c0_i32_0 : i32, i32
  }
  func.func @transform_2(%arg0: i32) -> (i32, i32) {
    %c0_i32 = arith.constant 0 : i32
    %c0_i32_0 = arith.constant 0 : i32
    %c0_i32_1 = arith.constant 0 : i32
    return %c0_i32, %c0_i32_0 : i32, i32
  }
  func.func @transform_3(%arg0: i32) -> (i32, i32) {
    %c0_i32 = arith.constant 0 : i32
    %c0_i32_0 = arith.constant 0 : i32
    %c0_i32_1 = arith.constant 0 : i32
    return %c0_i32, %c0_i32_0 : i32, i32
  }
  func.func @transform_4(%arg0: i32) -> (i32, i32) {
    %c0_i32 = arith.constant 0 : i32
    %c0_i32_0 = arith.constant 0 : i32
    %c0_i32_1 = arith.constant 0 : i32
    return %c0_i32, %c0_i32_0 : i32, i32
  }
  func.func @transform_5(%arg0: i32) -> (i32, i32) {
    %c0_i32 = arith.constant 0 : i32
    %c0_i32_0 = arith.constant 0 : i32
    %c0_i32_1 = arith.constant 0 : i32
    return %c0_i32, %c0_i32_0 : i32, i32
  }
  func.func @transform_6(%arg0: i32) -> (i32, i32) {
    %c0_i32 = arith.constant 0 : i32
    %c0_i32_0 = arith.constant 0 : i32
    %c0_i32_1 = arith.constant 0 : i32
    return %c0_i32, %c0_i32_0 : i32, i32
  }
  func.func @transform_7(%arg0: i32) -> (i32, i32) {
    %c0_i32 = arith.constant 0 : i32
    %c0_i32_0 = arith.constant 0 : i32
    %c0_i32_1 = arith.constant 0 : i32
    return %c0_i32, %c0_i32_0 : i32, i32
  }
  func.func @transform_8(%arg0: i32) -> (i32, i32) {
    %c0_i32 = arith.constant 0 : i32
    %c0_i32_0 = arith.constant 0 : i32
    %c0_i32_1 = arith.constant 0 : i32
    return %c0_i32, %c0_i32_0 : i32, i32
  }
  func.func @transform_9(%arg0: i32) -> (i32, i32) {
    %c0_i32 = arith.constant 0 : i32
    %c0_i32_0 = arith.constant 0 : i32
    %c0_i32_1 = arith.constant 0 : i32
    return %c0_i32, %c0_i32_0 : i32, i32
  }
  func.func @transform_10(%arg0: i32) -> (i32, i32) {
    %c0_i32 = arith.constant 0 : i32
    %c0_i32_0 = arith.constant 0 : i32
    %c0_i32_1 = arith.constant 0 : i32
    return %c0_i32, %c0_i32_0 : i32, i32
  }
  func.func @transform_11(%arg0: i32) -> (i32, i32, i32) {
    %c0_i32 = arith.constant 0 : i32
    %c0_i32_0 = arith.constant 0 : i32
    %c0_i32_1 = arith.constant 0 : i32
    return %arg0, %c0_i32, %c0_i32_0 : i32, i32, i32
  }
}

</mosaic_0001>

<bundles_post_ra>
// kernel: tpu_custom_call.1
= control target key start
LH: loop header
LB: loop body
LE: loop exit
PB: predicated region body
PF: predicated region fallthrough
CT: control target
= control target key end

     0   :  { %s3740_s0 = inlined_call_operand.hbm [shape: f32[2,16,256], index: 0, kind: input, shape index: {}]   ;;  %s3741_s1 = inlined_call_operand.hbm [shape: bf16[16,144], index: 1, kind: input, shape index: {}]   ;;  %s3742_s2 = inlined_call_operand.vmem [shape: f32[16,1], index: 2, kind: input, shape index: {}]   ;;  %s3743_s3 = inlined_call_operand.vmem [shape: f32[16,1], index: 3, kind: input, shape index: {}]   ;;  %s3744_s4 = inlined_call_operand.hbm [shape: bf16[16,144], index: 4, kind: input, shape index: {}]   ;;  %s3745_s5 = inlined_call_operand.vmem [shape: f32[16,1], index: 5, kind: input, shape index: {}]   ;;  %s3746_s6 = inlined_call_operand.vmem [shape: f32[16,1], index: 6, kind: input, shape index: {}]   ;;  %s3747_s7 = inlined_call_operand.vmem [shape: f32[144,256], index: 7, kind: input, shape index: {}]   ;;  %s3748_s8 = inlined_call_operand.vmem [shape: f32[256,8], index: 8, kind: input, shape index: {}]   ;;  %s3749_s9 = inlined_call_operand.hbm [shape: f32[8,256], index: 9, kind: input, shape index: {}]   ;;  %s3750_s10 = inlined_call_operand.vmem [shape: f32[32,32], index: 10, kind: input, shape index: {}]   ;;  %s3751_s11 = inlined_call_operand.hbm [shape: f32[2,16,256], index: 11, kind: output, shape index: {}]  }
   0x1   :  { %3764 = sst [smem:[#allocation18_spill]] %s3741_s1 }
   0x2   :  { %3765 = sst [smem:[#allocation19_spill]] %s3744_s4 }
   0x3   :  { %3766 = sst [smem:[#allocation20_spill]] %s3749_s9 }
   0x4   :  { %16 = vsyncpa [#allocation4], 0 }
   0x5   :  { %18 = vsyncpa [#allocation4 + $0x1], 0 }
   0x6   :  { %19 = vsyncpa [#allocation7], 0 }
   0x7   :  { %20 = vsyncpa [#allocation10], 0 }
   0x8   :  { %21 = vsyncpa [#allocation5], 0 }
   0x9   :  { %23 = vsyncpa [#allocation5 + $0x1], 0  ;;  %s2595_s17 = smov 0   ;;  %s2597_s18 = smov 0  }
   0xa   :  { %s2599_s19 = smov 0   ;;  %s2601_s20 = smov 0  }
   0xb LB: > { %3767 = sst [smem:[#allocation16_spill]] %s2512_s19  ;;  %s2616_s21 = sadd.s32 4294967295, %s2516_s20   ;;  %s2516_s20 = sphi %s2601_s20, %s3789_s20   ;;  %s2512_s19 = sphi %s2599_s19, %s3786_s19   ;;  %s2508_s18 = sphi %s2597_s18, %s3788_s18   ;;  %s2504_s17 = sphi %s2595_s17, %s3787_s17  }
   0xc   : > { %s1947_s22 = sadd.s32 4294967294, %s2516_s20   ;;  %p49_p0 = scmp.ne.s32.totalorder %s2508_s18, %s2504_s17 }
   0xd   : > { %p50_p1 = scmp.eq.s32.totalorder %s2616_s21, 0  ;;  %p283_p2 = scmp.eq.s32.totalorder %s2616_s21, 1 }
   0xe   : > { %p289_p3 = scmp.eq.s32.totalorder %s1947_s22, 1  ;;  %p1948_p5 = scmp.ge.s32.totalorder %s2516_s20, 1 }
   0xf   : > { %p2625_p4 = por %p50_p1, %p49_p0  ;;  %p296_p7 = scmp.lt.s32.totalorder %s2516_s20, 3 }
  0x10   : > { %p2630_p6 = por %p289_p3, %p49_p0  ;;  %s3770_s1 = sld [smem:[#allocation18_spill]] }
  0x11   : > { %p2638_p8 = pnand %p1948_p5, %p296_p7  ;;  %s2518_s29 = smov [#allocation6]  }
  0x12   : > { %s309_s30 = sshll.u32 %s2518_s29, 4  ;;  %s3773_s4 = sld [smem:[#allocation19_spill]]  ;;  %s310_s30 = int_to_ptr.vmem [resolvable:$true] %s309_s30 }
  0x13   : > { %p2213_p9 = pneg %p2638_p8  ;;  %s2519_s16 = smov 128  }
  0x14   : > { %s2520_s22 = smov 8   ;;  %s2521_s25 = smov [#allocation8]  }
  0x15   : > { %p2646_p10 = pnand %p2213_p9, %p50_p1  ;;  %s329_s26 = sshll.u32 %s2521_s25, 4  ;;  %s330_s26 = int_to_ptr.vmem [resolvable:$true] %s329_s26 }
  0x16   : > { %s307_s27 = sshll.u32 %s3770_s1, 4  ;;  %s3774_s9 = sld [smem:[#allocation20_spill]]  ;;  %s308_s27 = int_to_ptr.hbm [resolvable:$true] %s307_s27 }
  0x17   : > { %2216 = dma.hbm_to_vmem [thread:$0]  (!%p2646_p10), %s308_s27, 256, %s310_s30, [#allocation7], %s2519_s16, %s2519_s16, %s2520_s22  }
  0x18   : > { %s327_s15 = sshll.u32 %s3773_s4, 4  ;;  %s2522_s14 = smov [#allocation9]   ;;  %s328_s15 = int_to_ptr.hbm [resolvable:$true] %s327_s15 }
  0x19   : > { %2219 = dma.hbm_to_vmem [thread:$0]  (!%p2646_p10), %s328_s15, 256, %s330_s26, [#allocation7], %s2519_s16, %s2519_s16, %s2520_s22  }
  0x1a   : > { %s356_s4 = sshll.u32 %s2522_s14, 4  ;;  %s2662_s27 = sadd.s32 1, %s2516_s20   ;;  %s357_s4 = int_to_ptr.vmem [resolvable:$true] %s356_s4 }
  0x1b   : > { %s33_s30 = ssub.s32 %s2516_s20, %s2662_s27  ;;  %s36_s25 = sadd.s32 1, %s2512_s19 }
  0x1c   : > { %s354_s13 = sshll.u32 %s3774_s9, 4  ;;  %p34_p12 = scmp.eq.s32.totalorder %s33_s30, 0  ;;  %s355_s13 = int_to_ptr.hbm [resolvable:$true] %s354_s13 }
  0x1d   : > { %2222 = dma.hbm_to_vmem [thread:$0]  (!%p2646_p10), %s355_s13, 256, %s357_s4, [#allocation10]  }
  0x1e   : > { %p43_p13 = scmp.ne.s32.totalorder %s2512_s19, %s2508_s18  ;;  %p44_p0 = scmp.eq.s32.totalorder %s2516_s20, 0 }
  0x1f   : > { %p2234_p3 = scmp.lt.s32.totalorder %s2516_s20, 2  ;;  %s370_s16 = sand.u32 1, %s2512_s19  }
  0x20   : > { %s2674_s1 = scalar_select %p34_p12, %s2512_s19, %s36_s25  }
  0x21   : > { %p45_p5 = por %p44_p0, %p43_p13  ;;  %p2678_p7 = por %p283_p2, %p43_p13 }
  0x22   : > { %3775 = sst [smem:[#allocation17_spill]] %s2674_s1  ;;  %s2155_s22 = sshll.u32 %s2516_s20, 5 }
  0x23   : > { %s1953_s12 = sshll.u32 %s370_s16, 5  ;;  %s379_s29 = scalar_lea.hbm %s3740_s0, %s2155_s22 }
  0x24   : > { %s380_s13 = sshll.u32 %s379_s29, 4  ;;  %s374_s14 = scalar_lea.vmem [#allocation3], %s1953_s12  ;;  %s381_s13 = int_to_ptr.hbm [resolvable:$true] %s380_s13 }
  0x25   : > { %s382_s30 = sshll.u32 %s374_s14, 4  ;;  %p2689_p9 = pnand %p2234_p3, %p45_p5  ;;  %s383_s30 = int_to_ptr.vmem [resolvable:$true] %s382_s30 }
  0x26   : > { %s371_s9 = scalar_lea.sflag [#allocation4], %s370_s16  ;;  %s2412_s1 = sshra.s32 %s381_s13, 4  ;;  %s2413_s1 = int_to_ptr.hbm [resolvable:$true] %s2412_s1 }
  0x27   : > { %s2414_s19 = scalar_lea.hbm %s2413_s1, 32  ;;  %p2416_p10 = pneg %p2689_p9 }
  0x28   : > { %p2415_p2 = scmp.ne.s32.totalorder %s2413_s1, %s2414_s19  ;;  %s2419_s26 = scalar_lea.hbm %s3740_s0, 64 }
  0x29   : > { %p2420_p0 = scmp.lt.s32.totalorder %s2413_s1, %s3740_s0  ;;  %p2421_p3 = scmp.lt.s32.totalorder %s2419_s26, %s2414_s19 }
  0x2a   : > { %p2417_p12 = pnand %p2416_p10, %p2415_p2 }
  0x2b   : > { %p2422_p5 = por %p2421_p3, %p2420_p0 }
  0x2c   : > { %p2418_p13 = pneg %p2417_p12 }
  0x2e   : > { %p2423_p11 = pnand %p2422_p5, %p2418_p13 }
  0x30   : > { %2426 = shalt.err (!%p2423_p11)
}
  0x31   : > { %s2523_s16 = smov 256   ;;  %s2524_s14 = smov 16  }
  0x32   : > { %2226 = dma.hbm_to_vmem [thread:$0]  (!%p2689_p9), %s381_s13, 512, %s383_s30, %s371_s9, %s2523_s16, %s2523_s16, %s2524_s14  }
  0x33   : > { %394 = sbr.rel (%p2638_p8) target bundleno = 1708 (0x6ac), region = 64  ;;  %s2706_s22 = sand.u32 (!%p2638_p8), 1, %s2508_s18  }
  0x34   : > { %s3753_s1 = sshll.u32 (!%p2638_p8), %s2706_s22, 5  ;;  %s397_s19 = scalar_lea.sflag (!%p2638_p8), [#allocation4], %s2706_s22 }
  0x35   : > { %s2712_s12 = scalar_lea.vmem (!%p2638_p8), [#allocation3], %s3753_s1 }
  0x38   : > { %2487 = dma.done.wait (%p2625_p4), %s397_s19, 512  }
  0x39   : > { %2489 = vsyncadd (%p2625_p4), %s397_s19, 4294966784 }
  0x3a   : > { %2491 = dma.done.wait (%p50_p1), [#allocation7], 512  }
  0x3b   : > { %2493 = vsyncadd (%p50_p1), [#allocation7], 4294966784 }
  0x3c   : > { %2495 = dma.done.wait (%p50_p1), [#allocation10], 256  }
  0x3d   : > { %2497 = vsyncadd (%p50_p1), [#allocation10], 4294967040  ;;  %v2727_v0 = vld [vmem:[%s2712_s12 + $0x8] sm:$0xff]  ;;  %v2730_v1 = vld [vmem:[%s2712_s12] sm:$0xff]  ;;  %s2525_s9 = smov 112   ;;  %s2526_s23 = smov 113   ;;  %v510_v5 = vlaneseq }
  0x3e   : > { %670 = vrot.lane.b32.xlu1 %v2727_v0, %s2525_s9  ;;  %666 = vrot.lane.b32.xlu0 %v2730_v1, %s2525_s9  ;;  %v2739_v2 = vld [vmem:[%s2712_s12 + $0x18] sm:$0xff]  ;;  %v2742_v3 = vld [vmem:[%s2712_s12 + $0x10] sm:$0xff]  ;;  %s2527_s28 = smov 127   ;;  %s3758_s13 = smov 111   ;;  %vm833_vm6 = vcmask 130048   ;;  %vm993_vm9 = vcmask 261120  }
  0x3f   : > { %641 = vrot.lane.b32.xlu2 %v2730_v1, %s2526_s23  ;;  %s3760_s30 = smov 1   ;;  %s3762_s25 = smov 15   ;;  %v2802_v7 = vand.u32 127, %v510_v5  ;;  %v679_v8 = vld [vmem:[%s3747_s7 + $0xe0] sm:$0xff]  ;;  %v680_v9 = vld [vmem:[%s3747_s7 + $0xe8] sm:$0xff]  ;;  %v681_v18 = vld [vmem:[%s3747_s7 + $0xf0] sm:$0xff] }
  0x40   : > { %s3756_s26 = smov 16   ;;  %s3754_s4 = smov 17   ;;  %v682_v19 = vld [vmem:[%s3747_s7 + $0xf8] sm:$0xff]  ;;  %v656_v28 = vld [vmem:[%s3747_s7 + $0xd0] sm:$0xff]  ;;  %v654_v30 = vld [vmem:[%s3747_s7 + $0xc0] sm:$0xff]  ;;  %vm1089_vm13 = vcmask 64512  }
  0x41   : > { %vm674_vm0 = vcmp.lt.s32.totalorder %v2802_v7, 112  ;;  %v657_v29 = vld [vmem:[%s3747_s7 + $0xd8] sm:$0xff]  ;;  %vm649_vm1 = vcmp.lt.s32.totalorder %v2802_v7, 113  ;;  %v655_v31 = vld [vmem:[%s3747_s7 + $0xc8] sm:$0xff]  ;;  %v2841_v32 = vld [vmem:[%s3747_s7 + $0x80] sm:$0xff]  ;;  %vm624_vm2 = vcmp.lt.s32.totalorder %v2802_v7, 127 }
  0x42   : > { %v2846_v33 = vld [vmem:[%s3747_s7 + $0x88] sm:$0xff]  ;;  %v2851_v34 = vld [vmem:[%s3747_s7 + $0x90] sm:$0xff]  ;;  %v2856_v35 = vld [vmem:[%s3747_s7 + $0x98] sm:$0xff]  ;;  %v608_v36 = vmul.f32 %v2841_v32, %v2730_v1  ;;  %vm699_vm3 = vcmp.lt.s32.totalorder %v2802_v7, 111  ;;  %vm587_vm4 = vcmp.lt.s32.totalorder %v2802_v7, 1  ;;  %vm562_vm5 = vcmp.lt.s32.totalorder %v2802_v7, 15 }
  0x43   : > { %v609_v39 = vmul.f32 %v2846_v33, %v2727_v0  ;;  %v610_v40 = vmul.f32 %v2851_v34, %v2742_v3  ;;  %v611_v41 = vmul.f32 %v2856_v35, %v2739_v2  ;;  %v629_v57 = vld [vmem:[%s3747_s7 + $0xa0] sm:$0xff]  ;;  %v630_v59 = vld [vmem:[%s3747_s7 + $0xa8] sm:$0xff]  ;;  %v631_v60 = vld [vmem:[%s3747_s7 + $0xb0] sm:$0xff]  ;;  %vm537_vm7 = vcmp.lt.s32.totalorder %v2802_v7, 16  ;;  %s3778_s16 = smov 15   ;;  %s3779_s14 = smov 1  }
  0x44   : > { %v632_v61 = vld [vmem:[%s3747_s7 + $0xb8] sm:$0xff]  ;;  %vm512_vm8 = vcmp.lt.s32.totalorder %v2802_v7, 17 }
  0x45   : > { %v612_v50 = vpack.c.bf16 %v609_v39, %v608_v36  ;;  %v613_v53 = vpack.c.bf16 %v611_v41, %v610_v40 }
  0x46   : > { %672 = vrot.lane.b32.xlu1 %v2739_v2, %s2525_s9  ;;  %668 = vrot.lane.b32.xlu0 %v2742_v3, %s2525_s9 }
  0x47   : > { %643 = vrot.lane.b32.xlu2 %v2742_v3, %s2526_s23  ;;  %614 = vst [vmem:[#allocation2 + $0x40] sm:$0xff] %v612_v50 }
  0x48   : > { %615 = vst [vmem:[#allocation2 + $0x48] sm:$0xff] %v613_v53 }
  0x4e   : > { %647 = vrot.lane.b32.xlu1 %v2739_v2, %s2526_s23  ;;  %645 = vrot.lane.b32.xlu0 %v2727_v0, %s2526_s23 }
  0x4f   : > { %616 = vrot.lane.b32.xlu2 %v2730_v1, %s2527_s28 }
  0x56   : > { %620 = vrot.lane.b32.xlu1 %v2727_v0, %s2527_s28  ;;  %618 = vrot.lane.b32.xlu0 %v2742_v3, %s2527_s28 }
  0x57   : > { %622 = vrot.lane.b32.xlu2 %v2739_v2, %s2527_s28 }
  0x5e   : > { %693 = vrot.lane.b32.xlu1 %v2742_v3, %s3758_s13  ;;  %691 = vrot.lane.b32.xlu0 %v2730_v1, %s3758_s13 }
  0x5f   : > { %695 = vrot.lane.b32.xlu2 %v2727_v0, %s3758_s13 }
  0x66   : > { %579 = vrot.lane.b32.xlu1 %v2730_v1, %s3760_s30  ;;  %697 = vrot.lane.b32.xlu0 %v2739_v2, %s3758_s13  ;;  %s3780_s13 = smov 111  }
  0x67   : > { %581 = vrot.lane.b32.xlu2 %v2742_v3, %s3760_s30 }
  0x6e   : > { %585 = vrot.lane.b32.xlu1 %v2739_v2, %s3760_s30  ;;  %583 = vrot.lane.b32.xlu0 %v2727_v0, %s3760_s30  ;;  %s3781_s30 = smov 16  }
  0x6f   : > { %554 = vrot.lane.b32.xlu2 %v2730_v1, %s3762_s25 }
  0x76   : > { %558 = vrot.lane.b32.xlu1 %v2727_v0, %s3762_s25  ;;  %556 = vrot.lane.b32.xlu0 %v2742_v3, %s3762_s25 }
  0x77   : > { %560 = vrot.lane.b32.xlu2 %v2739_v2, %s3762_s25  ;;  %s3782_s25 = smov 17  }
  0x7e   : > { %531 = vrot.lane.b32.xlu1 %v2742_v3, %s3756_s26  ;;  %529 = vrot.lane.b32.xlu0 %v2730_v1, %s3756_s26 }
  0x7f   : > { %533 = vrot.lane.b32.xlu2 %v2727_v0, %s3756_s26 }
  0x86   : > { %502 = vrot.lane.b32.xlu1 %v2730_v1, %s3754_s4  ;;  %535 = vrot.lane.b32.xlu0 %v2739_v2, %s3756_s26 }
  0x87   : > { %504 = vrot.lane.b32.xlu2 %v2742_v3, %s3754_s4 }
  0x8e   : > { %508 = vrot.lane.b32.xlu1 %v2739_v2, %s3754_s4  ;;  %506 = vrot.lane.b32.xlu0 %v2727_v0, %s3754_s4 }
  0x99   : > { %v642_v4 = vpop.permute.xlu2 %641 }
  0xa1   : > { %v644_v6 = vpop.permute.xlu2 %643 }
  0xa9   : > { %v617_v14 = vpop.permute.xlu2 %616 }
  0xb0   : > { %v671_v10 = vpop.permute.xlu1 %670  ;;  %v667_v11 = vpop.permute.xlu0 %666 }
  0xb1   : > { %v675_v12 = vsel %vm674_vm0, %v667_v11, %v671_v10  ;;  %v677_v13 = vsel %vm674_vm0, %v671_v10, %v667_v11  ;;  %v623_v26 = vpop.permute.xlu2 %622 }
  0xb2   : > { %v683_v15 = vmul.f32 %v679_v8, %v675_v12  ;;  %v684_v16 = vmul.f32 %v680_v9, %v677_v13 }
  0xb4   : > { %v687_v17 = vpack.c.bf16 %v684_v16, %v683_v15  ;;  %v705_v15 = vld [vmem:[%s3747_s7 + $0x108] sm:$0xff] }
  0xb6   : > { %689 = vst [vmem:[#allocation2 + $0x70] sm:$0xff] %v687_v17 }
  0xb8   : > { %v673_v20 = vpop.permute.xlu1 %672  ;;  %v669_v21 = vpop.permute.xlu0 %668 }
  0xb9   : > { %v676_v22 = vsel %vm674_vm0, %v669_v21, %v673_v20  ;;  %v678_v23 = vsel %vm674_vm0, %v673_v20, %v669_v21  ;;  %v696_v56 = vpop.permute.xlu2 %695 }
  0xba   : > { %v685_v24 = vmul.f32 %v681_v18, %v676_v22  ;;  %v686_v25 = vmul.f32 %v682_v19, %v678_v23 }
  0xbc   : > { %v688_v27 = vpack.c.bf16 %v686_v25, %v685_v24  ;;  %v2004_v25 = vld [vmem:[#allocation2 + $0x40] sm:$0xf] }
  0xbd   : > { %v2028_v54 = vld [vmem:[#allocation2 + $0x70] sm:$0xf] }
  0xbe   : > { %690 = vst [vmem:[#allocation2 + $0x78] sm:$0xff] %v688_v27  ;;  %v2169_v27 = vld [vmem:[#allocation2 + $0x44] sm:$0xf0] }
  0xbf   : > { %v2005_v39 = vor.u32 %v2169_v27, %v2004_v25 }
  0xc0   : > { %v648_v37 = vpop.permute.xlu1 %647  ;;  %v646_v38 = vpop.permute.xlu0 %645 }
  0xc1   : > { %v651_v42 = vsel %vm649_vm1, %v644_v6, %v648_v37  ;;  %v653_v43 = vsel %vm649_vm1, %v648_v37, %v644_v6  ;;  %v650_v44 = vsel %vm649_vm1, %v642_v4, %v646_v38  ;;  %v652_v45 = vsel %vm649_vm1, %v646_v38, %v642_v4  ;;  %v582_v16 = vpop.permute.xlu2 %581 }
  0xc2   : > { %v660_v46 = vmul.f32 %v656_v28, %v651_v42  ;;  %v661_v47 = vmul.f32 %v657_v29, %v653_v43  ;;  %v658_v48 = vmul.f32 %v654_v30, %v650_v44  ;;  %v659_v49 = vmul.f32 %v655_v31, %v652_v45  ;;  %v706_v29 = vld [vmem:[%s3747_s7 + $0x110] sm:$0xff]  ;;  %v707_v30 = vld [vmem:[%s3747_s7 + $0x118] sm:$0xff] }
  0xc3   : > { %v594_v44 = vld [vmem:[%s3747_s7 + $0x70] sm:$0xff]  ;;  %v595_v45 = vld [vmem:[%s3747_s7 + $0x78] sm:$0xff] }
  0xc4   : > { %v663_v51 = vpack.c.bf16 %v661_v47, %v660_v46  ;;  %v662_v52 = vpack.c.bf16 %v659_v49, %v658_v48  ;;  %v2926_v46 = vld [vmem:[%s3747_s7 + $0x60] sm:$0xff]  ;;  %v2931_v47 = vld [vmem:[%s3747_s7 + $0x68] sm:$0xff] }
  0xc5   : > { %v2175_v55 = vld [vmem:[#allocation2 + $0x74] sm:$0xf0] }
  0xc6   : > { %665 = vst [vmem:[#allocation2 + $0x68] sm:$0xff] %v663_v51  ;;  %v2029_v58 = vor.u32 %v2175_v55, %v2028_v54 }
  0xc7   : > { %664 = vst [vmem:[#allocation2 + $0x60] sm:$0xff] %v662_v52 }
  0xc8   : > { %v621_v62 = vpop.permute.xlu1 %620  ;;  %837 = vmatpush.bf16.msra.mxu0 %v2029_v58  ;;  %v619_v63 = vpop.permute.xlu0 %618  ;;  %v2030_v58 = vld [vmem:[#allocation2 + $0x78] sm:$0xf0] }
  0xc9   : > { %v625_v0 = vsel %vm624_vm2, %v617_v14, %v621_v62  ;;  %v627_v1 = vsel %vm624_vm2, %v621_v62, %v617_v14  ;;  %v626_v2 = vsel %vm624_vm2, %v619_v63, %v623_v26  ;;  %v628_v3 = vsel %vm624_vm2, %v623_v26, %v619_v63  ;;  %v704_v14 = vld [vmem:[%s3747_s7 + $0x100] sm:$0xff]  ;;  %v555_v42 = vpop.permute.xlu2 %554  ;;  %v2156_v63 = vld [vmem:[#allocation6 + $0x4] sm:$0xf] }
  0xca   : > { %v633_v4 = vmul.f32 %v629_v57, %v625_v0  ;;  %v634_v5 = vmul.f32 %v630_v59, %v627_v1  ;;  %v635_v6 = vmul.f32 %v631_v60, %v626_v2  ;;  %v636_v8 = vmul.f32 %v632_v61, %v628_v3  ;;  %v1966_v0 = vld [vmem:[#allocation6 + $0x8] sm:$0xf0] }
  0xcc   : > { %v637_v9 = vpack.c.bf16 %v634_v5, %v633_v4  ;;  %v638_v10 = vpack.c.bf16 %v636_v8, %v635_v6  ;;  %v2947_v4 = vld [vmem:[%s3747_s7 + $0x40] sm:$0xff]  ;;  %v2174_v8 = vld [vmem:[#allocation2 + $0x74] sm:$0xf] }
  0xcd   : > { %v2173_v11 = vld [vmem:[#allocation2 + $0x64] sm:$0xf0] }
  0xce   : > { %639 = vst [vmem:[#allocation2 + $0x50] sm:$0xff] %v637_v9  ;;  %v2020_v12 = vld [vmem:[#allocation2 + $0x60] sm:$0xf]  ;;  %v2952_v9 = vld [vmem:[%s3747_s7 + $0x48] sm:$0xff] }
  0xcf   : > { %640 = vst [vmem:[#allocation2 + $0x58] sm:$0xff] %v638_v10  ;;  %v2021_v13 = vor.u32 %v2173_v11, %v2020_v12  ;;  %v569_v10 = vld [vmem:[%s3747_s7 + $0x50] sm:$0xff]  ;;  %v570_v11 = vld [vmem:[%s3747_s7 + $0x58] sm:$0xff]  ;;  %v2033_v12 = vor.u32 %v2174_v8, %v2030_v58 }
  0xd0   : > { %v694_v17 = vpop.permute.xlu1 %693  ;;  %v692_v18 = vpop.permute.xlu0 %691 }
  0xd1   : > { %838 = vmatpush.bf16.msra.mxu0 %v2021_v13  ;;  %v700_v19 = vsel %vm699_vm3, %v692_v18, %v696_v56  ;;  %v702_v20 = vsel %vm699_vm3, %v696_v56, %v692_v18  ;;  %v561_v61 = vpop.permute.xlu2 %560  ;;  %v1969_v13 = vor.u32 %v2156_v63, %v1966_v0 }
  0xd2   : > { %v708_v21 = vmul.f32 %v704_v14, %v700_v19  ;;  %v709_v22 = vmul.f32 %v705_v15, %v702_v20 }
  0xd4   : > { %v712_v23 = vpack.c.bf16 %v709_v22, %v708_v21 }
  0xd5   : > { %v2012_v24 = vld [vmem:[#allocation2 + $0x50] sm:$0xf] }
  0xd6   : > { %714 = vst [vmem:[#allocation2 + $0x80] sm:$0xff] %v712_v23  ;;  %v2171_v26 = vld [vmem:[#allocation2 + $0x54] sm:$0xf0] }
  0xd7   : > { %v2013_v28 = vor.u32 %v2171_v26, %v2012_v24 }
  0xd8   : > { %v580_v31 = vpop.permute.xlu1 %579  ;;  %v698_v36 = vpop.permute.xlu0 %697 }
  0xd9   : > { %839 = vmatpush.bf16.msra.mxu0 %v2013_v28  ;;  %v701_v37 = vsel %vm699_vm3, %v694_v17, %v698_v36  ;;  %v703_v38 = vsel %vm699_vm3, %v698_v36, %v694_v17  ;;  %v2022_v17 = vld [vmem:[#allocation2 + $0x68] sm:$0xf0]  ;;  %v2168_v36 = vld [vmem:[#allocation2 + $0x44] sm:$0xf] }
  0xda   : > { %v710_v40 = vmul.f32 %v706_v29, %v701_v37  ;;  %v711_v41 = vmul.f32 %v707_v30, %v703_v38  ;;  %v2170_v29 = vld [vmem:[#allocation2 + $0x54] sm:$0xf]  ;;  %v2014_v30 = vld [vmem:[#allocation2 + $0x58] sm:$0xf0]  ;;  %v534_v37 = vpop.permute.xlu2 %533 }
  0xdc   : > { %v713_v43 = vpack.c.bf16 %v711_v41, %v710_v40  ;;  %v542_v40 = vld [vmem:[%s3747_s7 + $0x20] sm:$0xff]  ;;  %v543_v41 = vld [vmem:[%s3747_s7 + $0x28] sm:$0xff] }
  0xdd   : > { %840 = vmatpush.bf16.msra.mxu0 %v2005_v39  ;;  %v2036_v62 = vld [vmem:[#allocation2 + $0x80] sm:$0xf]  ;;  %v2176_v2 = vld [vmem:[#allocation2 + $0x84] sm:$0xf]  ;;  %v2006_v39 = vld [vmem:[#allocation2 + $0x48] sm:$0xf0] }
  0xde   : > { %715 = vst [vmem:[#allocation2 + $0x88] sm:$0xff] %v713_v43  ;;  %v2017_v43 = vor.u32 %v2170_v29, %v2014_v30 }
  0xe0   : > { %v586_v48 = vpop.permute.xlu1 %585  ;;  %v584_v49 = vpop.permute.xlu0 %583 }
  0xe1   : > { %v589_v50 = vsel %vm587_vm4, %v582_v16, %v586_v48  ;;  %v591_v51 = vsel %vm587_vm4, %v586_v48, %v582_v16  ;;  %v588_v52 = vsel %vm587_vm4, %v580_v31, %v584_v49  ;;  %v590_v53 = vsel %vm587_vm4, %v584_v49, %v580_v31  ;;  %v2172_v16 = vld [vmem:[#allocation2 + $0x64] sm:$0xf] }
  0xe2   : > { %v598_v54 = vmul.f32 %v594_v44, %v591_v51  ;;  %v599_v55 = vmul.f32 %v595_v45, %v589_v50  ;;  %v596_v56 = vmul.f32 %v2926_v46, %v590_v53  ;;  %v597_v57 = vmul.f32 %v2931_v47, %v588_v52 }
  0xe3   : > { %v2025_v26 = vor.u32 %v2172_v16, %v2022_v17  ;;  %v2009_v50 = vor.u32 %v2168_v36, %v2006_v39  ;;  %v3037_v16 = vld [vmem:[%s3748_s8 + $0x58] sm:$0xff] }
  0xe4   : > { %v601_v59 = vpack.c.bf16 %v599_v55, %v598_v54  ;;  %v600_v60 = vpack.c.bf16 %v597_v57, %v596_v56  ;;  %v2986_v56 = vld [vmem:[%s3748_s8 + $0x78] sm:$0xff]  ;;  %v2991_v57 = vld [vmem:[%s3748_s8 + $0x70] sm:$0xff] }
  0xe5   : > { %v2177_v1 = vld [vmem:[#allocation2 + $0x84] sm:$0xf0]  ;;  %v2038_v3 = vld [vmem:[#allocation2 + $0x88] sm:$0xf0]  ;;  %897 = vmatpush.msra.mxu1 %v2986_v56 }
  0xe6   : > { %603 = vst [vmem:[#allocation2 + $0x38] sm:$0xff] %v601_v59  ;;  %v2037_v5 = vor.u32 %v2177_v1, %v2036_v62  ;;  %v2041_v6 = vor.u32 %v2176_v2, %v2038_v3  ;;  %v2997_v59 = vld [vmem:[%s3747_s7 + $0x30] sm:$0xff]  ;;  %v3007_v62 = vld [vmem:[%s3747_s7 + $0x38] sm:$0xff]  ;;  %v3013_v1 = vld [vmem:[%s3748_s8 + $0x68] sm:$0xff] }
  0xe7   : > { %602 = vst [vmem:[#allocation2 + $0x30] sm:$0xff] %v600_v60  ;;  %898 = vmatpush.msra.mxu1 %v2991_v57  ;;  %v3019_v2 = vld [vmem:[%s3748_s8 + $0xf0] sm:$0xff] }
  0xe8   : > { %v559_v14 = vpop.permute.xlu1 %558  ;;  %858 = vmatpush.bf16.msra.mxu2 %v2037_v5  ;;  %886 = vmatpush.bf16.msra.mxu3 %v2041_v6  ;;  %v557_v15 = vpop.permute.xlu0 %556 }
  0xe9   : > { %v563_v18 = vsel %vm562_vm5, %v555_v42, %v559_v14  ;;  %v565_v19 = vsel %vm562_vm5, %v559_v14, %v555_v42  ;;  %v564_v20 = vsel %vm562_vm5, %v557_v15, %v561_v61  ;;  %v566_v21 = vsel %vm562_vm5, %v561_v61, %v557_v15  ;;  %v3002_v61 = vld [vmem:[%s3748_s8 + $0xf8] sm:$0xff]  ;;  %899 = vmatpush.msra.mxu1 %v3013_v1 }
  0xea   : > { %v571_v22 = vmul.f32 %v2947_v4, %v565_v19  ;;  %v572_v23 = vmul.f32 %v2952_v9, %v563_v18  ;;  %v573_v24 = vmul.f32 %v569_v10, %v566_v21  ;;  %v574_v25 = vmul.f32 %v570_v11, %v564_v20  ;;  %v3044_v18 = vld [vmem:[%s3747_s7 + $0x10] sm:$0xff]  ;;  %v505_v19 = vpop.permute.xlu2 %504  ;;  %v3050_v20 = vld [vmem:[%s3747_s7 + $0x18] sm:$0xff]  ;;  %v517_v21 = vld [vmem:[%s3747_s7] sm:$0xff] }
  0xeb   : > { %2042 = vmatmul.msk.bf16.vlgmr.msra.gmra.mxu2 %vm833_vm6, %v1969_v13  ;;  %2043 = vmatmul.msk.bf16.vlgmr.msra.gmra.mxu3 %vm833_vm6, %v1969_v13 }
  0xec   : > { %865 = vmatpush.bf16.msrb.mxu2 %v2033_v12  ;;  %v575_v27 = vpack.c.bf16 %v572_v23, %v571_v22  ;;  %v576_v28 = vpack.c.bf16 %v574_v25, %v573_v24  ;;  %920 = vmatpush.msrb.mxu3 %v3002_v61  ;;  %v3028_v12 = vld [vmem:[%s3748_s8 + $0x60] sm:$0xff]  ;;  %v518_v22 = vld [vmem:[%s3747_s7 + $0x8] sm:$0xff] }
  0xed   : > { %v2167_v31 = vld [vmem:[#allocation2 + $0x34] sm:$0xf0]  ;;  %v1998_v53 = vld [vmem:[#allocation2 + $0x38] sm:$0xf0]  ;;  %900 = vmatpush.msra.mxu1 %v3028_v12 }
  0xee   : > { %577 = vst [vmem:[#allocation2 + $0x20] sm:$0xff] %v575_v27  ;;  %v1996_v38 = vld [vmem:[#allocation2 + $0x30] sm:$0xf]  ;;  %v2166_v55 = vld [vmem:[#allocation2 + $0x34] sm:$0xf]  ;;  %921 = vmatpush.msrb.mxu3 %v3019_v2 }
  0xef   : > { %578 = vst [vmem:[#allocation2 + $0x28] sm:$0xff] %v576_v28  ;;  %v1997_v42 = vor.u32 %v2167_v31, %v1996_v38  ;;  %v2001_v0 = vor.u32 %v2166_v55, %v1998_v53  ;;  %901 = vmatpush.msra.mxu1 %v3037_v16 }
  0xf0   : > { %866 = vmatpush.bf16.msrb.mxu2 %v2025_v26  ;;  %v532_v44 = vpop.permute.xlu1 %531  ;;  %v530_v45 = vpop.permute.xlu0 %529 }
  0xf1   : > { %v538_v48 = vsel %vm537_vm7, %v530_v45, %v534_v37  ;;  %v540_v49 = vsel %vm537_vm7, %v534_v37, %v530_v45  ;;  %841 = vmatpush.bf16.msra.mxu0 %v1997_v42  ;;  %v1964_v45 = vld [vmem:[#allocation6] sm:$0xf] }
  0xf2   : > { %v546_v51 = vmul.f32 %v542_v40, %v540_v49  ;;  %v547_v52 = vmul.f32 %v543_v41, %v538_v48 }
  0xf4   : > { %867 = vmatpush.bf16.msrb.mxu2 %v2017_v43  ;;  %v550_v54 = vpack.c.bf16 %v547_v52, %v546_v51 }
  0xf5   : > { %v1988_v58 = vld [vmem:[#allocation2 + $0x20] sm:$0xf]  ;;  %v2164_v6 = vld [vmem:[#allocation2 + $0x24] sm:$0xf] }
  0xf6   : > { %552 = vst [vmem:[#allocation2 + $0x10] sm:$0xff] %v550_v54  ;;  %v2165_v60 = vld [vmem:[#allocation2 + $0x24] sm:$0xf0]  ;;  %v1990_v8 = vld [vmem:[#allocation2 + $0x28] sm:$0xf0] }
  0xf7   : > { %v1989_v63 = vor.u32 %v2165_v60, %v1988_v58  ;;  %v1993_v15 = vor.u32 %v2164_v6, %v1990_v8  ;;  %v3078_v58 = vld [vmem:[%s3748_s8 + $0x50] sm:$0xff]  ;;  %v3083_v60 = vld [vmem:[%s3748_s8 + $0xe8] sm:$0xff]  ;;  %v3116_v6 = vld [vmem:[%s3748_s8 + $0x38] sm:$0xff] }
  0xf8   : > { %868 = vmatpush.bf16.msrb.mxu2 %v2009_v50  ;;  %v503_v3 = vpop.permute.xlu1 %502  ;;  %v536_v5 = vpop.permute.xlu0 %535  ;;  %v2157_v50 = vld [vmem:[#allocation6 + $0x4] sm:$0xf0]  ;;  %902 = vmatpush.msra.mxu1 %v3078_v58  ;;  %v3121_v8 = vld [vmem:[%s3748_s8 + $0xd0] sm:$0xff] }
  0xf9   : > { %v539_v10 = vsel %vm537_vm7, %v532_v44, %v536_v5  ;;  %v541_v11 = vsel %vm537_vm7, %v536_v5, %v532_v44  ;;  %842 = vmatpush.bf16.msra.mxu0 %v1989_v63  ;;  %v1965_v55 = vor.u32 %v2157_v50, %v1964_v45  ;;  %v3088_v63 = vld [vmem:[%s3748_s8 + $0x48] sm:$0xff]  ;;  %922 = vmatpush.msrb.mxu3 %v3083_v60  ;;  %v3107_v5 = vld [vmem:[%s3748_s8 + $0xd8] sm:$0xff] }
  0xfa   : > { %v548_v13 = vmul.f32 %v2997_v59, %v541_v11  ;;  %v549_v14 = vmul.f32 %v3007_v62, %v539_v10  ;;  %903 = vmatpush.msra.mxu1 %v3088_v63  ;;  %v3132_v10 = vld [vmem:[%s3748_s8 + $0x30] sm:$0xff]  ;;  %v3137_v11 = vld [vmem:[%s3748_s8 + $0xc8] sm:$0xff] }
  0xfc   : > { %869 = vmatpush.bf16.msrb.mxu2 %v2001_v0  ;;  %v551_v17 = vpack.c.bf16 %v549_v14, %v548_v13  ;;  %v3095_v0 = vld [vmem:[%s3748_s8 + $0xe0] sm:$0xff]  ;;  %v3144_v13 = vld [vmem:[%s3748_s8 + $0x28] sm:$0xff] }
  0xfd   : > { %v1980_v39 = vld [vmem:[#allocation2 + $0x10] sm:$0xf]  ;;  %v2162_v41 = vld [vmem:[#allocation2 + $0x14] sm:$0xf]  ;;  %923 = vmatpush.msrb.mxu3 %v3095_v0  ;;  %v3151_v14 = vld [vmem:[%s3748_s8 + $0xc0] sm:$0xff] }
  0xfe   : > { %553 = vst [vmem:[#allocation2 + $0x18] sm:$0xff] %v551_v17  ;;  %v3163_v17 = vld [vmem:[%s3748_s8 + $0xb8] sm:$0xff] }
  0xff   : > { %924 = vmatpush.msrb.mxu3 %v3107_v5 }
 0x100   : > { %870 = vmatpush.bf16.msrb.mxu2 %v1993_v15  ;;  %v509_v23 = vpop.permute.xlu1 %508  ;;  %v507_v24 = vpop.permute.xlu0 %506  ;;  %v3158_v15 = vld [vmem:[%s3748_s8 + $0x20] sm:$0xff] }
 0x101   : > { %v514_v25 = vsel %vm512_vm8, %v505_v19, %v509_v23  ;;  %v516_v26 = vsel %vm512_vm8, %v509_v23, %v505_v19  ;;  %v513_v27 = vsel %vm512_vm8, %v503_v3, %v507_v24  ;;  %v515_v28 = vsel %vm512_vm8, %v507_v24, %v503_v3  ;;  %v3102_v3 = vld [vmem:[%s3748_s8 + $0x40] sm:$0xff]  ;;  %925 = vmatpush.msrb.mxu3 %v3121_v8  ;;  %v3172_v19 = vld [vmem:[%s3748_s8 + $0x18] sm:$0xff]  ;;  %v3191_v23 = vld [vmem:[%s3748_s8 + $0xa8] sm:$0xff] }
 0x102   : > { %v523_v29 = vmul.f32 %v3044_v18, %v516_v26  ;;  %v524_v30 = vmul.f32 %v3050_v20, %v514_v25  ;;  %v521_v31 = vmul.f32 %v517_v21, %v515_v28  ;;  %v522_v36 = vmul.f32 %v518_v22, %v513_v27  ;;  %904 = vmatpush.msra.mxu1 %v3102_v3  ;;  %v3177_v21 = vld [vmem:[%s3748_s8 + $0xb0] sm:$0xff]  ;;  %v3204_v24 = vld [vmem:[%s3748_s8 + $0x8] sm:$0xff]  ;;  %v3209_v25 = vld [vmem:[%s3748_s8 + $0xa0] sm:$0xff] }
 0x103   : > { %926 = vmatpush.msrb.mxu3 %v3137_v11  ;;  %v3186_v22 = vld [vmem:[%s3748_s8 + $0x10] sm:$0xff]  ;;  %v3216_v26 = vld [vmem:[%s3748_s8] sm:$0xff]  ;;  %v3221_v27 = vld [vmem:[%s3748_s8 + $0x98] sm:$0xff] }
 0x104   : > { %v526_v37 = vpack.c.bf16 %v524_v30, %v523_v29  ;;  %v525_v38 = vpack.c.bf16 %v522_v36, %v521_v31  ;;  %905 = vmatpush.msra.mxu1 %v3116_v6  ;;  %v3230_v28 = vld [vmem:[%s3748_s8 + $0x90] sm:$0xff]  ;;  %v3238_v29 = vld [vmem:[%s3748_s8 + $0x88] sm:$0xff]  ;;  %v3245_v30 = vld [vmem:[%s3748_s8 + $0x80] sm:$0xff] }
 0x105   : > { %v2163_v40 = vld [vmem:[#allocation2 + $0x14] sm:$0xf0]  ;;  %v1982_v42 = vld [vmem:[#allocation2 + $0x18] sm:$0xf0]  ;;  %927 = vmatpush.msrb.mxu3 %v3151_v14 }
 0x106   : > { %528 = vst [vmem:[#allocation2 + $0x8] sm:$0xff] %v526_v37  ;;  %v1981_v43 = vor.u32 %v2163_v40, %v1980_v39  ;;  %v1985_v44 = vor.u32 %v2162_v41, %v1982_v42  ;;  %906 = vmatpush.msra.mxu1 %v3132_v10 }
 0x107   : > { %527 = vst [vmem:[#allocation2] sm:$0xff] %v525_v38  ;;  %928 = vmatpush.msrb.mxu3 %v3163_v17 }
 0x108   : > { %843 = vmatpush.bf16.msra.mxu0 %v1981_v43  ;;  %871 = vmatpush.bf16.msrb.mxu2 %v1985_v44 }
 0x109   : > { %907 = vmatpush.msra.mxu1 %v3144_v13  ;;  %929 = vmatpush.msrb.mxu3 %v3177_v21 }
 0x10b   : > { %908 = vmatpush.msra.mxu1 %v3158_v15  ;;  %930 = vmatpush.msrb.mxu3 %v3191_v23 }
 0x10d   : > { %v2161_v48 = vld [vmem:[#allocation2 + $0x4] sm:$0xf0]  ;;  %v1974_v49 = vld [vmem:[#allocation2 + $0x8] sm:$0xf0]  ;;  %909 = vmatpush.msra.mxu1 %v3172_v19  ;;  %931 = vmatpush.msrb.mxu3 %v3209_v25 }
 0x10e   : > { %v1972_v51 = vld [vmem:[#allocation2] sm:$0xf]  ;;  %v2160_v52 = vld [vmem:[#allocation2 + $0x4] sm:$0xf] }
 0x10f   : > { %v1973_v53 = vor.u32 %v2161_v48, %v1972_v51  ;;  %v1977_v54 = vor.u32 %v2160_v52, %v1974_v49  ;;  %910 = vmatpush.msra.mxu1 %v3186_v22  ;;  %932 = vmatpush.msrb.mxu3 %v3221_v27 }
 0x111   : > { %844 = vmatpush.bf16.msra.mxu0 %v1973_v53  ;;  %872 = vmatpush.bf16.msrb.mxu2 %v1977_v54 }
 0x112   : > { %911 = vmatpush.msra.mxu1 %v3204_v24  ;;  %933 = vmatpush.msrb.mxu3 %v3230_v28 }
 0x114   : > { %845 = vmatmul.bf16.vlgmr.msra.gmra.mxu0 %v1965_v55  ;;  %873 = vmatmul.bf16.vlgmr.msrb.gmra.mxu2 %v1965_v55 }
 0x115   : > { %947 = vmatpush.msrb.mxu0 %v2986_v56  ;;  %970 = vmatpush.msra.mxu2 %v3002_v61 }
 0x116   : > { %912 = vmatpush.msra.mxu1 %v3216_v26  ;;  %934 = vmatpush.msrb.mxu3 %v3238_v29 }
 0x117   : > { %948 = vmatpush.msrb.mxu0 %v2991_v57  ;;  %971 = vmatpush.msra.mxu2 %v3019_v2 }
 0x118   : > { %935 = vmatpush.msrb.mxu3 %v3245_v30 }
 0x119   : > { %949 = vmatpush.msrb.mxu0 %v3013_v1  ;;  %972 = vmatpush.msra.mxu2 %v3083_v60 }
 0x11b   : > { %950 = vmatpush.msrb.mxu0 %v3028_v12  ;;  %973 = vmatpush.msra.mxu2 %v3095_v0 }
 0x11d   : > { %951 = vmatpush.msrb.mxu0 %v3037_v16  ;;  %974 = vmatpush.msra.mxu2 %v3107_v5 }
 0x11f   : > { %952 = vmatpush.msrb.mxu0 %v3078_v58  ;;  %975 = vmatpush.msra.mxu2 %v3121_v8 }
 0x121   : > { %953 = vmatpush.msrb.mxu0 %v3088_v63  ;;  %976 = vmatpush.msra.mxu2 %v3137_v11 }
 0x123   : > { %954 = vmatpush.msrb.mxu0 %v3102_v3  ;;  %977 = vmatpush.msra.mxu2 %v3151_v14 }
 0x125   : > { %955 = vmatpush.msrb.mxu0 %v3116_v6  ;;  %978 = vmatpush.msra.mxu2 %v3163_v17 }
 0x127   : > { %956 = vmatpush.msrb.mxu0 %v3132_v10  ;;  %979 = vmatpush.msra.mxu2 %v3177_v21 }
 0x129   : > { %957 = vmatpush.msrb.mxu0 %v3144_v13  ;;  %980 = vmatpush.msra.mxu2 %v3191_v23 }
 0x12b   : > { %958 = vmatpush.msrb.mxu0 %v3158_v15  ;;  %981 = vmatpush.msra.mxu2 %v3209_v25 }
 0x12d   : > { %959 = vmatpush.msrb.mxu0 %v3172_v19  ;;  %982 = vmatpush.msra.mxu2 %v3221_v27 }
 0x12f   : > { %960 = vmatpush.msrb.mxu0 %v3186_v22  ;;  %983 = vmatpush.msra.mxu2 %v3230_v28 }
 0x131   : > { %961 = vmatpush.msrb.mxu0 %v3204_v24  ;;  %984 = vmatpush.msra.mxu2 %v3238_v29 }
 0x133   : > { %962 = vmatpush.msrb.mxu0 %v3216_v26  ;;  %985 = vmatpush.msra.mxu2 %v3245_v30 }
 0x16e   : > { %v860_v31 = vpop.f32.mrf.mxu2  ;;  %v888_v40 = vpop.f32.mrf.mxu3 }
 0x176   : > { %v862_v36 = vpop.f32.mrf.mxu2  ;;  %v890_v49 = vpop.f32.mrf.mxu3 }
 0x191   : > { %v846_v37 = vpop.f32.mrf.mxu0 }
 0x192   : > { %v3250_v38 = vadd.f32 %v860_v31, %v846_v37 }
 0x194   : > { %913 = vmatmul.f32.vlgmr.msra.gmra.mxu1 %v3250_v38  ;;  %v943_v39 = vmul.f32 %v3250_v38, %v3250_v38 }
 0x196   : > { %963 = vmatmul.f32.vlgmr.msrb.gmra.mxu0 %v943_v39 }
 0x197   : > { %v874_v41 = vpop.f32.mrf.mxu2 }
 0x198   : > { %v3255_v42 = vadd.f32 %v888_v40, %v874_v41  ;;  %v895_v41 = vld [vmem:[%s3743_s3] sm:$0xff] }
 0x199   : > { %v848_v43 = vpop.f32.mrf.mxu0 }
 0x19a   : > { %v944_v44 = vmul.f32 %v3255_v42, %v3255_v42  ;;  %v3259_v45 = vadd.f32 %v862_v36, %v848_v43  ;;  %936 = vmatmul.f32.vlgmr.msrb.gmra.mxu3 %v3255_v42  ;;  %v894_v43 = vld [vmem:[%s3742_s2 + $0x8] sm:$0xff] }
 0x19c   : > { %916 = vmatmul.f32.gmra.mxu1 %v3259_v45  ;;  %986 = vmatmul.f32.vlgmr.msra.gmra.mxu2 %v944_v44  ;;  %v945_v48 = vmul.f32 %v3259_v45, %v3259_v45 }
 0x19e   : > { %966 = vmatmul.f32.gmra.mxu0 %v945_v48  ;;  %v2533_v48 = vmov 0  }
 0x19f   : > { %v876_v50 = vpop.f32.mrf.mxu2  ;;  %2290 = vset.pattern.permute.xlu1 %v2533_v48  ;;  %2289 = vset.pattern.permute.xlu0 %v2533_v48 }
 0x1a0   : > { %v3265_v51 = vadd.f32 %v890_v49, %v876_v50  ;;  %1079 = vperm.xlu1 %2290, %v895_v41   ;;  %v893_v50 = vld [vmem:[%s3742_s2] sm:$0xff]  ;;  %1070 = vperm.xlu0 %2289, %v894_v43   ;;  %v3314_v41 = vld [vmem:[#allocation9 + $0x8] sm:$0xff]  ;;  %v3316_v43 = vld [vmem:[#allocation9] sm:$0xff] }
 0x1a1   : > { %2288 = vset.pattern.permute.xlu2 %v2533_v48  ;;  %1146 = vmatpush.msra.mxu0 %v3314_v41 }
 0x1a2   : > { %939 = vmatmul.f32.gmra.mxu3 %v3265_v51  ;;  %v946_v52 = vmul.f32 %v3265_v51, %v3265_v51  ;;  %1065 = vperm.xlu2 %2288, %v893_v50  }
 0x1a3   : > { %1117 = vmatpush.msra.mxu3 %v3316_v43  ;;  %1556 = vmatpush.msrb.mxu0 %v2986_v56 }
 0x1a4   : > { %989 = vmatmul.f32.gmra.mxu2 %v946_v52 }
 0x1a5   : > { %1557 = vmatpush.msrb.mxu0 %v2991_v57 }
 0x1a7   : > { %1558 = vmatpush.msrb.mxu0 %v3013_v1 }
 0x1a9   : > { %1559 = vmatpush.msrb.mxu0 %v3028_v12 }
 0x1ab   : > { %1560 = vmatpush.msrb.mxu0 %v3037_v16 }
 0x1ad   : > { %1561 = vmatpush.msrb.mxu0 %v3078_v58 }
 0x1af   : > { %1562 = vmatpush.msrb.mxu0 %v3088_v63 }
 0x1b1   : > { %1563 = vmatpush.msrb.mxu0 %v3102_v3 }
 0x1b3   : > { %1564 = vmatpush.msrb.mxu0 %v3116_v6 }
 0x1b5   : > { %1565 = vmatpush.msrb.mxu0 %v3132_v10 }
 0x1b7   : > { %1566 = vmatpush.msrb.mxu0 %v3144_v13 }
 0x1b9   : > { %1567 = vmatpush.msrb.mxu0 %v3158_v15 }
 0x1bb   : > { %1568 = vmatpush.msrb.mxu0 %v3172_v19 }
 0x1bd   : > { %1569 = vmatpush.msrb.mxu0 %v3186_v22 }
 0x1bf   : > { %1570 = vmatpush.msrb.mxu0 %v3204_v24 }
 0x1c1   : > { %1571 = vmatpush.msrb.mxu0 %v3216_v26 }
 0x211   : > { %v914_v31 = vpop.f32.mrf.mxu1 }
 0x213   : > { %v964_v53 = vpop.f32.mrf.mxu0 }
 0x219   : > { %v917_v49 = vpop.f32.mrf.mxu1 }
 0x21b   : > { %v967_v36 = vpop.f32.mrf.mxu0 }
 0x21d   : > { %v937_v54 = vpop.f32.mrf.mxu3 }
 0x21f   : > { %v987_v55 = vpop.f32.mrf.mxu2 }
 0x220   : > { %v988_v44 = vadd.f32 %v987_v55, %v964_v53  ;;  %v3282_v53 = vld [vmem:[%s3750_s10] sm:$0xff]  ;;  %v896_v55 = vld [vmem:[%s3743_s3 + $0x8] sm:$0xff] }
 0x221   : > { %1084 = vperm.xlu2 %2288, %v896_v55  }
 0x225   : > { %v940_v40 = vpop.f32.mrf.mxu3 }
 0x226   : > { %v941_v52 = vadd.f32 %v940_v40, %v917_v49 }
 0x227   : > { %v990_v37 = vpop.f32.mrf.mxu2 }
 0x228   : > { %v991_v39 = vadd.f32 %v990_v37, %v967_v36  ;;  %v938_v36 = vadd.f32 %v937_v54, %v914_v31  ;;  %v3292_v54 = vld [vmem:[%s3750_s10 + $0x8] sm:$0xff]  ;;  %v3299_v31 = vld [vmem:[%s3750_s10 + $0x10] sm:$0xff]  ;;  %v3306_v37 = vld [vmem:[%s3750_s10 + $0x18] sm:$0xff] }
 0x22a   : > { %1018 = vmatpush.msrb.mxu1 %v991_v39 }
 0x22c   : > { %1019 = vmatpush.msrb.mxu1 %v988_v44 }
 0x22e   : > { %1020 = vmatpush.msrb.mxu1 %v941_v52 }
 0x230   : > { %1021 = vmatpush.msrb.mxu1 %v938_v36 }
 0x231   : > { %2044 = vmatmul.msk.f32.vlgmr.msrb.gmra.mxu1 %vm993_vm9, %v3282_v53 }
 0x239   : > { %2045 = vmatmul.msk.f32.gmra.mxu1 %vm993_vm9, %v3292_v54 }
 0x241   : > { %2046 = vmatmul.msk.f32.gmra.mxu1 %vm993_vm9, %v3299_v31 }
 0x249   : > { %2047 = vmatmul.msk.f32.gmra.mxu1 %vm993_vm9, %v3306_v37 }
 0x2ae   : > { %v3310_v39 = vpop.f32.mrf.mxu1 }
 0x2af   : > { %v1035_v44 = vmul.f32 %v3310_v39, %v3310_v39 }
 0x2b6   : > { %v3312_v40 = vpop.f32.mrf.mxu1 }
 0x2b7   : > { %v1036_v56 = vmul.f32 %v3312_v40, %v3312_v40 }
 0x2be   : > { %v1029_v48 = vpop.f32.mrf.mxu1 }
 0x2bf   : > { %v1037_v49 = vsub.f32 %v1029_v48, %v1035_v44 }
 0x2c1   : > { %v1039_v50 = vmax.f32 %v1037_v49, 0.0  ;;  %v1066_v49 = vpop.permute.xlu2 %1065 }
 0x2c3   : > { %v1041_v52 = vadd.f32 1e-05, %v1039_v50 }
 0x2c5   : > { %2291 = vrsqrt.f32 %v1041_v52  ;;  %vm1049_vm11 = vweird.f32 %v1041_v52 }
 0x2c6   : > { %v1032_v57 = vpop.f32.mrf.mxu1 }
 0x2c7   : > { %v1038_v36 = vsub.f32 %v1032_v57, %v1036_v56  ;;  %v1071_v57 = vpop.permute.xlu0 %1070 }
 0x2c9   : > { %v1040_v1 = vmax.f32 %v1038_v36, 0.0 }
 0x2cb   : > { %v2292_v12 = vpop.eup %2291  ;;  %v1042_v55 = vadd.f32 1e-05, %v1040_v1 }
 0x2cc   : > { %v1044_v16 = vmul.f32 %v2292_v12, %v1041_v52  ;;  %vm1050_vm10 = vweird.f32 %v2292_v12 }
 0x2cd   : > { %2293 = vrsqrt.f32 %v1042_v55  ;;  %vm1051_vm12 = vmor %vm1049_vm11, %vm1050_vm10  ;;  %vm1059_vm15 = vweird.f32 %v1042_v55 }
 0x2ce   : > { %v1045_v58 = vmul.f32 %v2292_v12, %v1044_v16  ;;  %v1080_v16 = vpop.permute.xlu1 %1079 }
 0x2d0   : > { %v1046_v44 = vmul.f32 0.5, %v1045_v58 }
 0x2d2   : > { %v1047_v63 = vsub.f32 1.5, %v1046_v44 }
 0x2d3   : > { %v2294_v3 = vpop.eup %2293 }
 0x2d4   : > { %v1054_v6 = vmul.f32 %v2294_v3, %v1042_v55  ;;  %v1048_v48 = vmul.f32 %v2292_v12, %v1047_v63  ;;  %vm1060_vm14 = vweird.f32 %v2294_v3  ;;  %v1085_v63 = vpop.permute.xlu2 %1084 }
 0x2d5   : > { %vm1061_vm10 = vmor %vm1059_vm15, %vm1060_vm14 }
 0x2d6   : > { %v1055_v10 = vmul.f32 %v2294_v3, %v1054_v6  ;;  %v1052_v13 = vsel %vm1051_vm12, %v2292_v12, %v1048_v48 }
 0x2d7   : > { %v1073_v50 = vmul.f32 %v1066_v49, %v1052_v13 }
 0x2d8   : > { %v1056_v15 = vmul.f32 0.5, %v1055_v10 }
 0x2d9   : > { %2048 = vmatmul.msk.f32.vlgmr.msra.gmra.mxu3 %vm1089_vm13, %v1073_v50  ;;  %2052 = vmatmul.msk.f32.vlgmr.msra.gmra.mxu0 %vm1089_vm13, %v1073_v50  ;;  %v1075_v12 = vmul.f32 %v1073_v50, %v3310_v39 }
 0x2da   : > { %v1057_v56 = vsub.f32 1.5, %v1056_v15 }
 0x2db   : > { %v1087_v58 = vsub.f32 %v1080_v16, %v1075_v12 }
 0x2dc   : > { %v1058_v36 = vmul.f32 %v2294_v3, %v1057_v56 }
 0x2de   : > { %v1062_v52 = vsel %vm1061_vm10, %v2294_v3, %v1058_v36 }
 0x2df   : > { %v1074_v1 = vmul.f32 %v1071_v57, %v1062_v52 }
 0x2e1   : > { %2049 = vmatmul.msk.f32.gmra.mxu3 %vm1089_vm13, %v1074_v1  ;;  %2053 = vmatmul.msk.f32.gmra.mxu0 %vm1089_vm13, %v1074_v1  ;;  %v1076_v44 = vmul.f32 %v1074_v1, %v3312_v40 }
 0x2e3   : > { %v1088_v6 = vsub.f32 %v1085_v63, %v1076_v44 }
 0x2e9   : > { %2050 = vmatmul.msk.f32.gmra.mxu3 %vm1089_vm13, %v1087_v58  ;;  %2054 = vmatmul.msk.f32.gmra.mxu0 %vm1089_vm13, %v1087_v58 }
 0x2f1   : > { %2051 = vmatmul.msk.f32.gmra.mxu3 %vm1089_vm13, %v1088_v6  ;;  %2055 = vmatmul.msk.f32.gmra.mxu0 %vm1089_vm13, %v1088_v6 }
 0x356   : > { %v1148_v55 = vpop.f32.mrf.mxu0 }
 0x357   : > { %v1161_v39 = vmul.f32 %v1148_v55, %v3255_v42  ;;  %v1555_v55 = vld [vmem:[%s3746_s6 + $0x8] sm:$0xff] }
 0x35c   : > { %v1119_v3 = vpop.f32.mrf.mxu3 }
 0x35d   : > { %v1160_v15 = vmul.f32 %v1119_v3, %v3250_v38 }
 0x35e   : > { %v1151_v48 = vpop.f32.mrf.mxu0 }
 0x35f   : > { %v1163_v36 = vmul.f32 %v1151_v48, %v3265_v51 }
 0x364   : > { %v1122_v10 = vpop.f32.mrf.mxu3 }
 0x365   : > { %v1162_v16 = vmul.f32 %v1122_v10, %v3259_v45  ;;  %v1554_v45 = vld [vmem:[%s3746_s6] sm:$0xff] }
 0x366   : > { %v1154_v49 = vpop.f32.mrf.mxu0 }
 0x367   : > { %v1165_v13 = vadd.f32 %v1161_v39, %v1154_v49  ;;  %v1316_v39 = vld [vmem:[%s3747_s7 + $0xc0] sm:$0xff]  ;;  %v1317_v49 = vld [vmem:[%s3747_s7 + $0xc8] sm:$0xff] }
 0x369   : > { %v1169_v50 = vmax.f32 %v1165_v13, 0.0 }
 0x36b   : > { %1284 = vrot.lane.b32.xlu2 %v1169_v50, %s2527_s28  ;;  %1308 = vrot.lane.b32.xlu1 %v1169_v50, %s2526_s23  ;;  %v1273_v1 = vmul.f32 %v1169_v50, %v2846_v33 }
 0x36c   : > { %1332 = vrot.lane.b32.xlu0 %v1169_v50, %s2525_s9  ;;  %v1125_v40 = vpop.f32.mrf.mxu3 }
 0x36d   : > { %v1164_v56 = vadd.f32 %v1160_v15, %v1125_v40 }
 0x36e   : > { %v1157_v57 = vpop.f32.mrf.mxu0 }
 0x36f   : > { %v1168_v52 = vmax.f32 %v1164_v56, 0.0  ;;  %v1167_v12 = vadd.f32 %v1163_v36, %v1157_v57 }
 0x371   : > { %v1272_v42 = vmul.f32 %v1168_v52, %v2841_v32  ;;  %v1171_v44 = vmax.f32 %v1167_v12, 0.0 }
 0x373   : > { %v1276_v38 = vpack.c.bf16 %v1273_v1, %v1272_v42  ;;  %1224 = vrot.lane.b32.xlu2 %v1169_v50, %s3778_s16  ;;  %1248 = vrot.lane.b32.xlu1 %v1169_v50, %s3779_s14  ;;  %v1275_v6 = vmul.f32 %v1171_v44, %v2856_v35  ;;  %v1553_v35 = vld [vmem:[%s3745_s5 + $0x8] sm:$0xff] }
 0x374   : > { %1356 = vrot.lane.b32.xlu0 %v1169_v50, %s3780_s13  ;;  %v1128_v58 = vpop.f32.mrf.mxu3 }
 0x375   : > { %1278 = vst [vmem:[#allocation2 + $0x40] sm:$0xff] %v1276_v38  ;;  %v1166_v63 = vadd.f32 %v1162_v16, %v1128_v58 }
 0x377   : > { %v1170_v51 = vmax.f32 %v1166_v63, 0.0 }
 0x379   : > { %v1274_v33 = vmul.f32 %v1170_v51, %v2851_v34  ;;  %v1552_v34 = vld [vmem:[%s3745_s5] sm:$0xff] }
 0x37b   : > { %v1277_v32 = vpack.c.bf16 %v1275_v6, %v1274_v33  ;;  %1304 = vrot.lane.b32.xlu2 %v1168_v52, %s2526_s23  ;;  %1328 = vrot.lane.b32.xlu1 %v1168_v52, %s2525_s9  ;;  %v1341_v6 = vld [vmem:[%s3747_s7 + $0xe8] sm:$0xff]  ;;  %v1292_v33 = vld [vmem:[%s3747_s7 + $0xa0] sm:$0xff] }
 0x37c   : > { %1280 = vrot.lane.b32.xlu0 %v1168_v52, %s2527_s28 }
 0x37d   : > { %1279 = vst [vmem:[#allocation2 + $0x48] sm:$0xff] %v1277_v32 }
 0x383   : > { %1244 = vrot.lane.b32.xlu2 %v1168_v52, %s3779_s14  ;;  %1352 = vrot.lane.b32.xlu1 %v1168_v52, %s3780_s13 }
 0x384   : > { %1220 = vrot.lane.b32.xlu0 %v1168_v52, %s3778_s16 }
 0x38b   : > { %1196 = vrot.lane.b32.xlu1 %v1168_v52, %s3781_s30  ;;  %1310 = vrot.lane.b32.xlu2 %v1171_v44, %s2526_s23 }
 0x38c   : > { %1286 = vrot.lane.b32.xlu0 %v1171_v44, %s2527_s28 }
 0x393   : > { %1250 = vrot.lane.b32.xlu2 %v1171_v44, %s3779_s14  ;;  %1334 = vrot.lane.b32.xlu1 %v1171_v44, %s2525_s9 }
 0x394   : > { %1226 = vrot.lane.b32.xlu0 %v1171_v44, %s3778_s16 }
 0x39b   : > { %1358 = vrot.lane.b32.xlu1 %v1171_v44, %s3780_s13  ;;  %1330 = vrot.lane.b32.xlu2 %v1170_v51, %s2525_s9  ;;  %s2196_s9 = sshll.u32 %s2616_s21, 5  ;;  %s1830_s21 = scalar_lea.sflag [#allocation5], %s2706_s22 }
 0x39c   : > { %1306 = vrot.lane.b32.xlu0 %v1170_v51, %s2526_s23  ;;  %s1841_s26 = scalar_lea.hbm %s3751_s11, %s2196_s9 }
 0x39d   : > { %s1844_s19 = sshll.u32 %s1841_s26, 4  ;;  %s1845_s19 = int_to_ptr.hbm [resolvable:$true] %s1844_s19 }
 0x39e   : > { %s2456_s1 = sshra.s32 %s1845_s19, 4  ;;  %s2457_s1 = int_to_ptr.hbm [resolvable:$true] %s2456_s1 }
 0x39f   : > { %s2458_s29 = scalar_lea.hbm %s2457_s1, 32  ;;  %p2463_p11 = scmp.lt.s32.totalorder %s2457_s1, %s3751_s11 }
 0x3a0   : > { %p2459_p1 = scmp.ne.s32.totalorder %s2457_s1, %s2458_s29 }
 0x3a2   : > { %p2460_p4 = pnand %p2459_p1, %p2678_p7 }
 0x3a3   : > { %1282 = vrot.lane.b32.xlu1 %v1170_v51, %s2527_s28  ;;  %1354 = vrot.lane.b32.xlu2 %v1170_v51, %s3780_s13  ;;  %s3783_s13 = sshll.u32 %s2706_s22, 5 }
 0x3a4   : > { %1246 = vrot.lane.b32.xlu0 %v1170_v51, %s3779_s14  ;;  %p2461_p8 = pneg %p2460_p4 }
 0x3ab   : > { %1202 = vrot.lane.b32.xlu1 %v1171_v44, %s3781_s30  ;;  %1172 = vrot.lane.b32.xlu2 %v1168_v52, %s3782_s25 }
 0x3ac   : > { %1200 = vrot.lane.b32.xlu0 %v1169_v50, %s3781_s30 }
 0x3b3   : > { %1222 = vrot.lane.b32.xlu1 %v1170_v51, %s3778_s16  ;;  %1198 = vrot.lane.b32.xlu2 %v1170_v51, %s3781_s30 }
 0x3b4   : > { %1174 = vrot.lane.b32.xlu0 %v1170_v51, %s3782_s25  ;;  %v1340_v51 = vld [vmem:[%s3747_s7 + $0xe0] sm:$0xff] }
 0x3bb   : > { %1176 = vrot.lane.b32.xlu1 %v1169_v50, %s3782_s25  ;;  %1178 = vrot.lane.b32.xlu2 %v1171_v44, %s3782_s25  ;;  %s454_s25 = scalar_lea.vmem [#allocation11], %s3783_s13 }
 0x3bc   : > { %1711 = vperm.xlu0 %2289, %v1552_v34   ;;  %s1842_s4 = sshll.u32 %s454_s25, 4  ;;  %s1843_s4 = int_to_ptr.vmem [resolvable:$true] %s1842_s4 }
 0x3c3   : > { %1716 = vperm.xlu1 %2290, %v1553_v35   ;;  %1725 = vperm.xlu2 %2288, %v1554_v45  }
 0x3c4   : > { %1730 = vperm.xlu0 %2289, %v1555_v55  }
 0x3c5   : > { %v1285_v3 = vpop.permute.xlu2 %1284 }
 0x3cd   : > { %v1225_v48 = vpop.permute.xlu2 %1224 }
 0x3d5   : > { %v1305_v10 = vpop.permute.xlu2 %1304 }
 0x3dd   : > { %v1309_v13 = vpop.permute.xlu1 %1308  ;;  %v1245_v36 = vpop.permute.xlu2 %1244 }
 0x3de   : > { %v1312_v50 = vsel %vm649_vm1, %v1305_v10, %v1309_v13  ;;  %v1314_v15 = vsel %vm649_vm1, %v1309_v13, %v1305_v10  ;;  %v1333_v40 = vpop.permute.xlu0 %1332 }
 0x3df   : > { %v1320_v56 = vmul.f32 %v1316_v39, %v1312_v50  ;;  %v1321_v57 = vmul.f32 %v1317_v49, %v1314_v15 }
 0x3e1   : > { %v1324_v52 = vpack.c.bf16 %v1321_v57, %v1320_v56  ;;  %v1365_v57 = vld [vmem:[%s3747_s7 + $0x108] sm:$0xff] }
 0x3e3   : > { %1326 = vst [vmem:[#allocation2 + $0x60] sm:$0xff] %v1324_v52 }
 0x3e5   : > { %v1249_v1 = vpop.permute.xlu1 %1248  ;;  %v3418_v63 = vpop.permute.xlu2 %1310 }
 0x3e6   : > { %v1252_v42 = vsel %vm587_vm4, %v1245_v36, %v1249_v1  ;;  %v1254_v12 = vsel %vm587_vm4, %v1249_v1, %v1245_v36  ;;  %v1357_v16 = vpop.permute.xlu0 %1356 }
 0x3e7   : > { %v1260_v38 = vmul.f32 %v1254_v12, %v2926_v46  ;;  %v1261_v58 = vmul.f32 %v1252_v42, %v2931_v47  ;;  %v1293_v46 = vld [vmem:[%s3747_s7 + $0xa8] sm:$0xff] }
 0x3e9   : > { %v1264_v44 = vpack.c.bf16 %v1261_v58, %v1260_v38 }
 0x3eb   : > { %1266 = vst [vmem:[#allocation2 + $0x30] sm:$0xff] %v1264_v44 }
 0x3ed   : > { %v1329_v47 = vpop.permute.xlu1 %1328  ;;  %v3440_v56 = vpop.permute.xlu2 %1250 }
 0x3ee   : > { %v1281_v32 = vpop.permute.xlu0 %1280  ;;  %v1336_v34 = vsel %vm674_vm0, %v1329_v47, %v1333_v40  ;;  %v1338_v35 = vsel %vm674_vm0, %v1333_v40, %v1329_v47  ;;  %v1364_v40 = vld [vmem:[%s3747_s7 + $0x100] sm:$0xff] }
 0x3ef   : > { %v1288_v45 = vsel %vm624_vm2, %v1281_v32, %v1285_v3  ;;  %v1290_v55 = vsel %vm624_vm2, %v1285_v3, %v1281_v32  ;;  %v1344_v10 = vmul.f32 %v1340_v51, %v1336_v34  ;;  %v1345_v39 = vmul.f32 %v1341_v6, %v1338_v35  ;;  %v1342_v32 = vld [vmem:[%s3747_s7 + $0xf0] sm:$0xff] }
 0x3f0   : > { %v1296_v49 = vmul.f32 %v1292_v33, %v1288_v45  ;;  %v1297_v13 = vmul.f32 %v1293_v46, %v1290_v55 }
 0x3f1   : > { %v1348_v50 = vpack.c.bf16 %v1345_v39, %v1344_v10 }
 0x3f2   : > { %v1300_v15 = vpack.c.bf16 %v1297_v13, %v1296_v49  ;;  %v1366_v49 = vld [vmem:[%s3747_s7 + $0x110] sm:$0xff]  ;;  %v1367_v13 = vld [vmem:[%s3747_s7 + $0x118] sm:$0xff] }
 0x3f3   : > { %1350 = vst [vmem:[#allocation2 + $0x70] sm:$0xff] %v1348_v50 }
 0x3f4   : > { %1302 = vst [vmem:[#allocation2 + $0x50] sm:$0xff] %v1300_v15  ;;  %v1318_v15 = vld [vmem:[%s3747_s7 + $0xd0] sm:$0xff] }
 0x3f5   : > { %v1353_v36 = vpop.permute.xlu1 %1352  ;;  %v1331_v47 = vpop.permute.xlu2 %1330 }
 0x3f6   : > { %v1221_v3 = vpop.permute.xlu0 %1220  ;;  %v1360_v52 = vsel %vm699_vm3, %v1353_v36, %v1357_v16  ;;  %v1362_v1 = vsel %vm699_vm3, %v1357_v16, %v1353_v36 }
 0x3f7   : > { %v1228_v42 = vsel %vm562_vm5, %v1221_v3, %v1225_v48  ;;  %v1230_v12 = vsel %vm562_vm5, %v1225_v48, %v1221_v3  ;;  %v1368_v38 = vmul.f32 %v1364_v40, %v1360_v52  ;;  %v1369_v58 = vmul.f32 %v1365_v57, %v1362_v1  ;;  %v1343_v48 = vld [vmem:[%s3747_s7 + $0xf8] sm:$0xff] }
 0x3f8   : > { %v1236_v44 = vmul.f32 %v1230_v12, %v2947_v4  ;;  %v1237_v51 = vmul.f32 %v1228_v42, %v2952_v9  ;;  %v1319_v40 = vld [vmem:[%s3747_s7 + $0xd8] sm:$0xff] }
 0x3f9   : > { %v1372_v6 = vpack.c.bf16 %v1369_v58, %v1368_v38 }
 0x3fa   : > { %v1240_v33 = vpack.c.bf16 %v1237_v51, %v1236_v44  ;;  %v2122_v51 = vld [vmem:[#allocation2 + $0x70] sm:$0xf] }
 0x3fb   : > { %1374 = vst [vmem:[#allocation2 + $0x80] sm:$0xff] %v1372_v6 }
 0x3fc   : > { %1242 = vst [vmem:[#allocation2 + $0x20] sm:$0xff] %v1240_v33 }
 0x3fd   : > { %v3458_v46 = vpop.permute.xlu1 %1196  ;;  %v1355_v10 = vpop.permute.xlu2 %1354 }
 0x3fe   : > { %v1287_v16 = vpop.permute.xlu0 %1286 }
 0x405   : > { %v1335_v34 = vpop.permute.xlu1 %1334  ;;  %v3494_v6 = vpop.permute.xlu2 %1172 }
 0x406   : > { %v3466_v4 = vpop.permute.xlu0 %1226  ;;  %v1337_v9 = vsel %vm674_vm0, %v1331_v47, %v1335_v34  ;;  %v1339_v35 = vsel %vm674_vm0, %v1335_v34, %v1331_v47 }
 0x407   : > { %v1346_v45 = vmul.f32 %v1342_v32, %v1337_v9  ;;  %v1347_v55 = vmul.f32 %v1343_v48, %v1339_v35  ;;  %v2192_v32 = vld [vmem:[#allocation2 + $0x74] sm:$0xf] }
 0x408   : > { %v1294_v35 = vld [vmem:[%s3747_s7 + $0xb0] sm:$0xff] }
 0x409   : > { %v1349_v39 = vpack.c.bf16 %v1347_v55, %v1346_v45  ;;  %v1258_v55 = vld [vmem:[%s3747_s7 + $0x70] sm:$0xff] }
 0x40b   : > { %1351 = vst [vmem:[#allocation2 + $0x78] sm:$0xff] %v1349_v39 }
 0x40d   : > { %v1359_v50 = vpop.permute.xlu1 %1358 }
 0x40e   : > { %v1361_v57 = vsel %vm699_vm3, %v1355_v10, %v1359_v50  ;;  %v1363_v36 = vsel %vm699_vm3, %v1359_v50, %v1355_v10  ;;  %v1307_v3 = vpop.permute.xlu0 %1306  ;;  %v1259_v10 = vld [vmem:[%s3747_s7 + $0x78] sm:$0xff] }
 0x40f   : > { %v1370_v52 = vmul.f32 %v1366_v49, %v1361_v57  ;;  %v1371_v1 = vmul.f32 %v1367_v13, %v1363_v36  ;;  %v1313_v42 = vsel %vm649_vm1, %v1307_v3, %v3418_v63  ;;  %v1315_v12 = vsel %vm649_vm1, %v3418_v63, %v1307_v3  ;;  %v1295_v63 = vld [vmem:[%s3747_s7 + $0xb8] sm:$0xff] }
 0x410   : > { %v1322_v38 = vmul.f32 %v1318_v15, %v1313_v42  ;;  %v1323_v58 = vmul.f32 %v1319_v40, %v1315_v12  ;;  %v2130_v42 = vld [vmem:[#allocation2 + $0x80] sm:$0xf]  ;;  %v2190_v12 = vld [vmem:[#allocation2 + $0x64] sm:$0xf] }
 0x411   : > { %v1373_v44 = vpack.c.bf16 %v1371_v1, %v1370_v52  ;;  %v2114_v1 = vld [vmem:[#allocation2 + $0x60] sm:$0xf] }
 0x412   : > { %v1325_v33 = vpack.c.bf16 %v1323_v58, %v1322_v38  ;;  %v2193_v47 = vld [vmem:[#allocation2 + $0x74] sm:$0xf0]  ;;  %v2124_v48 = vld [vmem:[#allocation2 + $0x78] sm:$0xf0]  ;;  %v2158_v38 = vld [vmem:[#allocation8 + $0x4] sm:$0xf] }
 0x413   : > { %1375 = vst [vmem:[#allocation2 + $0x88] sm:$0xff] %v1373_v44  ;;  %v2123_v34 = vor.u32 %v2193_v47, %v2122_v51  ;;  %v2127_v9 = vor.u32 %v2192_v32, %v2124_v48  ;;  %v2060_v58 = vld [vmem:[#allocation8 + $0x8] sm:$0xf0]  ;;  %v2194_v51 = vld [vmem:[#allocation2 + $0x84] sm:$0xf] }
 0x414   : > { %1327 = vst [vmem:[#allocation2 + $0x68] sm:$0xff] %v1325_v33 }
 0x415   : > { %v1283_v45 = vpop.permute.xlu1 %1282  ;;  %1496 = vmatpush.bf16.msra.mxu1 %v2123_v34  ;;  %1524 = vmatpush.bf16.msrb.mxu3 %v2127_v9  ;;  %v1199_v9 = vpop.permute.xlu2 %1198 }
 0x416   : > { %v1289_v39 = vsel %vm624_vm2, %v1283_v45, %v1287_v16  ;;  %v1291_v49 = vsel %vm624_vm2, %v1287_v16, %v1283_v45  ;;  %v1247_v13 = vpop.permute.xlu0 %1246 }
 0x417   : > { %v1298_v50 = vmul.f32 %v1294_v35, %v1289_v39  ;;  %v1299_v15 = vmul.f32 %v1295_v63, %v1291_v49  ;;  %v1253_v40 = vsel %vm587_vm4, %v1247_v13, %v3440_v56  ;;  %v1255_v57 = vsel %vm587_vm4, %v3440_v56, %v1247_v13 }
 0x418   : > { %v1262_v36 = vmul.f32 %v1258_v55, %v1255_v57  ;;  %v1263_v3 = vmul.f32 %v1259_v10, %v1253_v40  ;;  %v3518_v63 = vor.u32 %v2158_v38, %v2060_v58  ;;  %v2299_v40 = vld [vmem:[%s3747_s7 + $0x20] sm:$0xff]  ;;  %v2187_v58 = vld [vmem:[#allocation2 + $0x44] sm:$0xf0] }
 0x419   : > { %v1301_v52 = vpack.c.bf16 %v1299_v15, %v1298_v50 }
 0x41a   : > { %v1265_v16 = vpack.c.bf16 %v1263_v3, %v1262_v36  ;;  %v2195_v44 = vld [vmem:[#allocation2 + $0x84] sm:$0xf0]  ;;  %v2132_v33 = vld [vmem:[#allocation2 + $0x88] sm:$0xf0]  ;;  %v2106_v3 = vld [vmem:[#allocation2 + $0x50] sm:$0xf] }
 0x41b   : > { %1303 = vst [vmem:[#allocation2 + $0x58] sm:$0xff] %v1301_v52  ;;  %v2191_v47 = vld [vmem:[#allocation2 + $0x64] sm:$0xf0]  ;;  %v2131_v32 = vor.u32 %v2195_v44, %v2130_v42  ;;  %v2116_v48 = vld [vmem:[#allocation2 + $0x68] sm:$0xf0]  ;;  %v2135_v34 = vor.u32 %v2194_v51, %v2132_v33  ;;  %v1234_v44 = vld [vmem:[%s3747_s7 + $0x50] sm:$0xff] }
 0x41c   : > { %1267 = vst [vmem:[#allocation2 + $0x38] sm:$0xff] %v1265_v16  ;;  %v2115_v56 = vor.u32 %v2191_v47, %v2114_v1  ;;  %v2119_v35 = vor.u32 %v2190_v12, %v2116_v48  ;;  %v2188_v1 = vld [vmem:[#allocation2 + $0x54] sm:$0xf]  ;;  %v2100_v16 = vld [vmem:[#allocation2 + $0x48] sm:$0xf0] }
 0x41d   : > { %v1203_v45 = vpop.permute.xlu1 %1202  ;;  %1517 = vmatpush.bf16.msrb.mxu2 %v2131_v32  ;;  %v2098_v33 = vld [vmem:[#allocation2 + $0x40] sm:$0xf]  ;;  %v2186_v47 = vld [vmem:[#allocation2 + $0x44] sm:$0xf]  ;;  %v1179_v32 = vpop.permute.xlu2 %1178 }
 0x41e   : > { %v1205_v55 = vsel %vm537_vm7, %v1199_v9, %v1203_v45  ;;  %v1207_v10 = vsel %vm537_vm7, %v1203_v45, %v1199_v9  ;;  %v1201_v39 = vpop.permute.xlu0 %1200  ;;  %1497 = vmatpush.bf16.msra.mxu1 %v2115_v56  ;;  %1525 = vmatpush.bf16.msrb.mxu3 %v2119_v35  ;;  %v2099_v9 = vor.u32 %v2187_v58, %v2098_v33 }
 0x41f   : > { %v1214_v49 = vmul.f32 %v1207_v10, %v2997_v59  ;;  %v1215_v13 = vmul.f32 %v1205_v55, %v3007_v62  ;;  %v1204_v50 = vsel %vm537_vm7, %v3458_v46, %v1201_v39  ;;  %v1206_v15 = vsel %vm537_vm7, %v1201_v39, %v3458_v46  ;;  %v2300_v59 = vld [vmem:[%s3747_s7 + $0x28] sm:$0xff] }
 0x420   : > { %v1212_v57 = vmul.f32 %v2299_v40, %v1206_v15  ;;  %v1213_v36 = vmul.f32 %v2300_v59, %v1204_v50  ;;  %2136 = vmatmul.msk.bf16.vlgmr.msrb.gmra.mxu2 %vm833_vm6, %v3518_v63  ;;  %v2103_v56 = vor.u32 %v2186_v47, %v2100_v16  ;;  %v2090_v15 = vld [vmem:[#allocation2 + $0x30] sm:$0xf]  ;;  %v2184_v40 = vld [vmem:[#allocation2 + $0x34] sm:$0xf] }
 0x421   : > { %1545 = vmatpush.bf16.msra.mxu2 %v2135_v34  ;;  %v1217_v62 = vpack.c.bf16 %v1215_v13, %v1214_v49 }
 0x422   : > { %v1216_v52 = vpack.c.bf16 %v1213_v36, %v1212_v57  ;;  %v2189_v46 = vld [vmem:[#allocation2 + $0x54] sm:$0xf0]  ;;  %v2108_v42 = vld [vmem:[#allocation2 + $0x58] sm:$0xf0] }
 0x423   : > { %1219 = vst [vmem:[#allocation2 + $0x18] sm:$0xff] %v1217_v62  ;;  %v2107_v12 = vor.u32 %v2189_v46, %v2106_v3  ;;  %v2111_v38 = vor.u32 %v2188_v1, %v2108_v42  ;;  %v2185_v13 = vld [vmem:[#allocation2 + $0x34] sm:$0xf0]  ;;  %v2092_v50 = vld [vmem:[#allocation2 + $0x38] sm:$0xf0] }
 0x424   : > { %1218 = vst [vmem:[#allocation2 + $0x10] sm:$0xff] %v1216_v52  ;;  %v2091_v57 = vor.u32 %v2185_v13, %v2090_v15  ;;  %v2095_v59 = vor.u32 %v2184_v40, %v2092_v50  ;;  %v2082_v52 = vld [vmem:[#allocation2 + $0x20] sm:$0xf]  ;;  %v2311_v13 = vld [vmem:[%s3748_s8 + $0x58] sm:$0xff]  ;;  %v2315_v15 = vld [vmem:[%s3748_s8 + $0x48] sm:$0xff] }
 0x425   : > { %1629 = vmatpush.msrb.mxu2 %v3002_v61  ;;  %v1235_v61 = vld [vmem:[%s3747_s7 + $0x58] sm:$0xff]  ;;  %v1223_v51 = vpop.permute.xlu1 %1222  ;;  %1498 = vmatpush.bf16.msra.mxu1 %v2107_v12  ;;  %v2316_v40 = vld [vmem:[%s3748_s8 + $0xc8] sm:$0xff] }
 0x426   : > { %1526 = vmatpush.bf16.msrb.mxu3 %v2111_v38  ;;  %v1229_v48 = vsel %vm562_vm5, %v1223_v51, %v3466_v4  ;;  %v1175_v34 = vpop.permute.xlu0 %1174  ;;  %v2312_v50 = vld [vmem:[%s3748_s8 + $0xd8] sm:$0xff] }
 0x427   : > { %1630 = vmatpush.msrb.mxu2 %v3019_v2  ;;  %v1231_v2 = vsel %vm562_vm5, %v3466_v4, %v1223_v51  ;;  %v1239_v45 = vmul.f32 %v1235_v61, %v1229_v48  ;;  %v1181_v55 = vsel %vm512_vm8, %v1175_v34, %v1179_v32  ;;  %v1183_v10 = vsel %vm512_vm8, %v1179_v32, %v1175_v34  ;;  %v2058_v61 = vld [vmem:[#allocation8] sm:$0xf]  ;;  %v2159_v51 = vld [vmem:[#allocation8 + $0x4] sm:$0xf0] }
 0x428   : > { %v1238_v35 = vmul.f32 %v1234_v44, %v1231_v2  ;;  %v1190_v39 = vmul.f32 %v1183_v10, %v3044_v18  ;;  %v1191_v49 = vmul.f32 %v1181_v55, %v3050_v20  ;;  %v2059_v34 = vor.u32 %v2159_v51, %v2058_v61  ;;  %v2307_v55 = vld [vmem:[%s3748_s8 + $0x68] sm:$0xff] }
 0x429   : > { %1631 = vmatpush.msrb.mxu2 %v3083_v60  ;;  %1499 = vmatpush.bf16.msra.mxu1 %v2099_v9  ;;  %v2303_v9 = vld [vmem:[%s3748_s8 + $0x78] sm:$0xff]  ;;  %v2308_v10 = vld [vmem:[%s3748_s8 + $0xe8] sm:$0xff] }
 0x42a   : > { %v1241_v4 = vpack.c.bf16 %v1239_v45, %v1238_v35  ;;  %1527 = vmatpush.bf16.msrb.mxu3 %v2103_v56  ;;  %v1193_v60 = vpack.c.bf16 %v1191_v49, %v1190_v39  ;;  %v2181_v42 = vld [vmem:[#allocation2 + $0x14] sm:$0xf0]  ;;  %v2076_v58 = vld [vmem:[#allocation2 + $0x18] sm:$0xf0]  ;;  %v2305_v35 = vld [vmem:[%s3748_s8 + $0x70] sm:$0xff] }
 0x42b   : > { %1632 = vmatpush.msrb.mxu2 %v3095_v0  ;;  %v2074_v12 = vld [vmem:[#allocation2 + $0x10] sm:$0xf]  ;;  %v2180_v38 = vld [vmem:[#allocation2 + $0x14] sm:$0xf]  ;;  %v2304_v56 = vld [vmem:[%s3748_s8 + $0xf8] sm:$0xff] }
 0x42c   : > { %1243 = vst [vmem:[#allocation2 + $0x28] sm:$0xff] %v1241_v4  ;;  %v2079_v16 = vor.u32 %v2180_v38, %v2076_v58  ;;  %v2306_v45 = vld [vmem:[%s3748_s8 + $0xf0] sm:$0xff]  ;;  %v2309_v39 = vld [vmem:[%s3748_s8 + $0x60] sm:$0xff] }
 0x42d   : > { %1633 = vmatpush.msrb.mxu2 %v3107_v5  ;;  %1195 = vst [vmem:[#allocation2 + $0x8] sm:$0xff] %v1193_v60  ;;  %v1177_v18 = vpop.permute.xlu1 %1176  ;;  %1500 = vmatpush.bf16.msra.mxu1 %v2091_v57  ;;  %v2301_v5 = vld [vmem:[%s3747_s7] sm:$0xff]  ;;  %v2313_v4 = vld [vmem:[%s3748_s8 + $0x50] sm:$0xff] }
 0x42e   : > { %1528 = vmatpush.bf16.msrb.mxu3 %v2095_v59  ;;  %v1180_v20 = vsel %vm512_vm8, %v3494_v6, %v1177_v18  ;;  %v1182_v0 = vsel %vm512_vm8, %v1177_v18, %v3494_v6  ;;  %v2182_v6 = vld [vmem:[#allocation2 + $0x24] sm:$0xf]  ;;  %v2314_v60 = vld [vmem:[%s3748_s8 + $0xd0] sm:$0xff]  ;;  %v2318_v59 = vld [vmem:[%s3748_s8 + $0x38] sm:$0xff] }
 0x42f   : > { %1634 = vmatpush.msrb.mxu2 %v3121_v8  ;;  %v1188_v36 = vmul.f32 %v2301_v5, %v1182_v0  ;;  %v2302_v8 = vld [vmem:[%s3747_s7 + $0x8] sm:$0xff]  ;;  %v2310_v49 = vld [vmem:[%s3748_s8 + $0xe0] sm:$0xff]  ;;  %v2319_v18 = vld [vmem:[%s3748_s8 + $0x30] sm:$0xff] }
 0x430   : > { %v1189_v62 = vmul.f32 %v2302_v8, %v1180_v20  ;;  %2137 = vmatmul.msk.bf16.vlgmr.msra.gmra.mxu2 %vm833_vm6, %v3518_v63  ;;  %v2075_v63 = vor.u32 %v2181_v42, %v2074_v12  ;;  %v2317_v57 = vld [vmem:[%s3748_s8 + $0x40] sm:$0xff]  ;;  %v2320_v20 = vld [vmem:[%s3748_s8 + $0x28] sm:$0xff] }
 0x431   : > { %1635 = vmatpush.msrb.mxu2 %v3137_v11 }
 0x432   : > { %v1192_v3 = vpack.c.bf16 %v1189_v62, %v1188_v36 }
 0x433   : > { %1636 = vmatpush.msrb.mxu2 %v3151_v14  ;;  %v2183_v7 = vld [vmem:[#allocation2 + $0x24] sm:$0xf0]  ;;  %v2084_v11 = vld [vmem:[#allocation2 + $0x28] sm:$0xf0] }
 0x434   : > { %1194 = vst [vmem:[#allocation2] sm:$0xff] %v1192_v3  ;;  %v2083_v46 = vor.u32 %v2183_v7, %v2082_v52  ;;  %v2087_v1 = vor.u32 %v2182_v6, %v2084_v11  ;;  %v2179_v44 = vld [vmem:[#allocation2 + $0x4] sm:$0xf0]  ;;  %v2068_v32 = vld [vmem:[#allocation2 + $0x8] sm:$0xf0] }
 0x435   : > { %1637 = vmatpush.msrb.mxu2 %v3163_v17 }
 0x436   : > { %1501 = vmatpush.bf16.msra.mxu1 %v2083_v46  ;;  %1529 = vmatpush.bf16.msrb.mxu3 %v2087_v1 }
 0x437   : > { %1638 = vmatpush.msrb.mxu2 %v3177_v21 }
 0x439   : > { %1639 = vmatpush.msrb.mxu2 %v3191_v23 }
 0x43a   : > { %1502 = vmatpush.bf16.msra.mxu1 %v2075_v63  ;;  %1530 = vmatpush.bf16.msrb.mxu3 %v2079_v16 }
 0x43b   : > { %v2066_v33 = vld [vmem:[#allocation2] sm:$0xf]  ;;  %v2178_v47 = vld [vmem:[#allocation2 + $0x4] sm:$0xf]  ;;  %1640 = vmatpush.msrb.mxu2 %v3209_v25 }
 0x43c   : > { %v2067_v48 = vor.u32 %v2179_v44, %v2066_v33  ;;  %v2071_v2 = vor.u32 %v2178_v47, %v2068_v32 }
 0x43d   : > { %1641 = vmatpush.msrb.mxu2 %v3221_v27 }
 0x43e   : > { %1503 = vmatpush.bf16.msra.mxu1 %v2067_v48  ;;  %1531 = vmatpush.bf16.msrb.mxu3 %v2071_v2 }
 0x43f   : > { %1642 = vmatpush.msrb.mxu2 %v3230_v28 }
 0x441   : > { %1504 = vmatmul.bf16.vlgmr.msra.gmra.mxu1 %v2059_v34  ;;  %1532 = vmatmul.bf16.vlgmr.msrb.gmra.mxu3 %v2059_v34 }
 0x442   : > { %1606 = vmatpush.msra.mxu3 %v2303_v9  ;;  %1579 = vmatpush.msrb.mxu1 %v2304_v56 }
 0x443   : > { %1643 = vmatpush.msrb.mxu2 %v3238_v29 }
 0x444   : > { %1607 = vmatpush.msra.mxu3 %v2305_v35  ;;  %1580 = vmatpush.msrb.mxu1 %v2306_v45  ;;  %v1712_v45 = vpop.permute.xlu0 %1711 }
 0x445   : > { %1644 = vmatpush.msrb.mxu2 %v3245_v30 }
 0x446   : > { %1608 = vmatpush.msra.mxu3 %v2307_v55  ;;  %1581 = vmatpush.msrb.mxu1 %v2308_v10 }
 0x448   : > { %1609 = vmatpush.msra.mxu3 %v2309_v39  ;;  %1582 = vmatpush.msrb.mxu1 %v2310_v49 }
 0x44a   : > { %1610 = vmatpush.msra.mxu3 %v2311_v13  ;;  %1583 = vmatpush.msrb.mxu1 %v2312_v50 }
 0x44c   : > { %1611 = vmatpush.msra.mxu3 %v2313_v4  ;;  %1584 = vmatpush.msrb.mxu1 %v2314_v60  ;;  %v1717_v4 = vpop.permute.xlu1 %1716 }
 0x44e   : > { %1612 = vmatpush.msra.mxu3 %v2315_v15  ;;  %1585 = vmatpush.msrb.mxu1 %v2316_v40 }
 0x450   : > { %1613 = vmatpush.msra.mxu3 %v2317_v57  ;;  %1586 = vmatpush.msrb.mxu1 %v3151_v14  ;;  %v2321_v14 = vld [vmem:[%s3748_s8 + $0x20] sm:$0xff]  ;;  %v1726_v57 = vpop.permute.xlu2 %1725 }
 0x452   : > { %1614 = vmatpush.msra.mxu3 %v2318_v59  ;;  %1587 = vmatpush.msrb.mxu1 %v3163_v17 }
 0x454   : > { %1615 = vmatpush.msra.mxu3 %v2319_v18  ;;  %1588 = vmatpush.msrb.mxu1 %v3177_v21 }
 0x456   : > { %1616 = vmatpush.msra.mxu3 %v2320_v20  ;;  %1589 = vmatpush.msrb.mxu1 %v3191_v23  ;;  %v1731_v20 = vpop.permute.xlu0 %1730 }
 0x458   : > { %1617 = vmatpush.msra.mxu3 %v2321_v14  ;;  %1590 = vmatpush.msrb.mxu1 %v3209_v25 }
 0x45a   : > { %1618 = vmatpush.msra.mxu3 %v3172_v19  ;;  %1591 = vmatpush.msrb.mxu1 %v3221_v27 }
 0x45c   : > { %1619 = vmatpush.msra.mxu3 %v3186_v22  ;;  %1592 = vmatpush.msrb.mxu1 %v3230_v28 }
 0x45e   : > { %1620 = vmatpush.msra.mxu3 %v3204_v24  ;;  %1593 = vmatpush.msrb.mxu1 %v3238_v29 }
 0x460   : > { %1621 = vmatpush.msra.mxu3 %v3216_v26  ;;  %1594 = vmatpush.msrb.mxu1 %v3245_v30 }
 0x462   : > { %1791 = vmatpush.msrb.mxu3 %v3314_v41  ;;  %1762 = vmatpush.msra.mxu1 %v3316_v43 }
 0x4a3   : > { %v1519_v17 = vpop.f32.mrf.mxu2 }
 0x4ab   : > { %v1521_v19 = vpop.f32.mrf.mxu2 }
 0x4b3   : > { %v1547_v24 = vpop.f32.mrf.mxu2 }
 0x4bb   : > { %v1549_v41 = vpop.f32.mrf.mxu2 }
 0x4be   : > { %v1505_v21 = vpop.f32.mrf.mxu1 }
 0x4bf   : > { %v3660_v23 = vadd.f32 %v1519_v17, %v1505_v21 }
 0x4c1   : > { %v1602_v22 = vmul.f32 %v3660_v23, %v3660_v23  ;;  %1572 = vmatmul.f32.vlgmr.msrb.gmra.mxu0 %v3660_v23 }
 0x4c3   : > { %1622 = vmatmul.f32.vlgmr.msra.gmra.mxu3 %v1602_v22 }
 0x4c4   : > { %v1533_v25 = vpop.f32.mrf.mxu3 }
 0x4c5   : > { %v3665_v26 = vadd.f32 %v1547_v24, %v1533_v25 }
 0x4c6   : > { %v1507_v27 = vpop.f32.mrf.mxu1 }
 0x4c7   : > { %v1603_v28 = vmul.f32 %v3665_v26, %v3665_v26  ;;  %v3669_v29 = vadd.f32 %v1521_v19, %v1507_v27  ;;  %1595 = vmatmul.f32.vlgmr.msrb.gmra.mxu1 %v3665_v26  ;;  %v1813_v27 = vld [vmem:[%s2712_s12] sm:$0xff] }
 0x4c9   : > { %1575 = vmatmul.f32.gmra.mxu0 %v3669_v29  ;;  %1645 = vmatmul.f32.vlgmr.msrb.gmra.mxu2 %v1603_v28  ;;  %v1604_v30 = vmul.f32 %v3669_v29, %v3669_v29 }
 0x4cb   : > { %1625 = vmatmul.f32.gmra.mxu3 %v1604_v30 }
 0x4cc   : > { %v1535_v43 = vpop.f32.mrf.mxu3 }
 0x4cd   : > { %v3675_v0 = vadd.f32 %v1549_v41, %v1535_v43 }
 0x4cf   : > { %1598 = vmatmul.f32.gmra.mxu1 %v3675_v0  ;;  %v1605_v5 = vmul.f32 %v3675_v0, %v3675_v0 }
 0x4d1   : > { %1648 = vmatmul.f32.gmra.mxu2 %v1605_v5 }
 0x53e   : > { %v1573_v3 = vpop.f32.mrf.mxu0 }
 0x544   : > { %v1596_v8 = vpop.f32.mrf.mxu1 }
 0x545   : > { %v1597_v12 = vadd.f32 %v1596_v8, %v1573_v3 }
 0x546   : > { %v1623_v36 = vpop.f32.mrf.mxu3  ;;  %v1576_v1 = vpop.f32.mrf.mxu0 }
 0x54c   : > { %v1646_v62 = vpop.f32.mrf.mxu2  ;;  %v1599_v11 = vpop.f32.mrf.mxu1 }
 0x54d   : > { %v1647_v46 = vadd.f32 %v1646_v62, %v1623_v36  ;;  %v1600_v42 = vadd.f32 %v1599_v11, %v1576_v1  ;;  %v1814_v36 = vld [vmem:[%s2712_s12 + $0x8] sm:$0xff]  ;;  %v1816_v1 = vld [vmem:[%s2712_s12 + $0x18] sm:$0xff] }
 0x54e   : > { %v1626_v52 = vpop.f32.mrf.mxu3 }
 0x554   : > { %v1649_v7 = vpop.f32.mrf.mxu2 }
 0x555   : > { %v1650_v6 = vadd.f32 %v1649_v7, %v1626_v52  ;;  %v1815_v52 = vld [vmem:[%s2712_s12 + $0x10] sm:$0xff]  ;;  %s2462_s12 = scalar_lea.hbm %s3751_s11, 64 }
 0x556   : > { %p2464_p9 = scmp.lt.s32.totalorder %s2462_s12, %s2458_s29 }
 0x557   : > { %1664 = vmatpush.msra.mxu0 %v1650_v6 }
 0x558   : > { %p2465_p2 = por %p2464_p9, %p2463_p11 }
 0x559   : > { %1665 = vmatpush.msra.mxu0 %v1647_v46 }
 0x55a   : > { %p2466_p10 = pnand %p2465_p2, %p2461_p8 }
 0x55b   : > { %1666 = vmatpush.msra.mxu0 %v1600_v42 }
 0x55d   : > { %1667 = vmatpush.msra.mxu0 %v1597_v12 }
 0x55e   : > { %2138 = vmatmul.msk.f32.vlgmr.msra.gmra.mxu0 %vm993_vm9, %v3282_v53 }
 0x566   : > { %2139 = vmatmul.msk.f32.gmra.mxu0 %vm993_vm9, %v3292_v54 }
 0x56e   : > { %2140 = vmatmul.msk.f32.gmra.mxu0 %vm993_vm9, %v3299_v31 }
 0x576   : > { %2141 = vmatmul.msk.f32.gmra.mxu0 %vm993_vm9, %v3306_v37 }
 0x5db   : > { %v1669_v38 = vpop.f32.mrf.mxu0 }
 0x5dc   : > { %v1681_v63 = vmul.f32 %v1669_v38, %v1669_v38 }
 0x5e3   : > { %v1672_v58 = vpop.f32.mrf.mxu0 }
 0x5e4   : > { %v1682_v33 = vmul.f32 %v1672_v58, %v1672_v58 }
 0x5eb   : > { %v1675_v16 = vpop.f32.mrf.mxu0 }
 0x5ec   : > { %v1683_v44 = vsub.f32 %v1675_v16, %v1681_v63 }
 0x5ee   : > { %v1685_v61 = vmax.f32 %v1683_v44, 0.0 }
 0x5f0   : > { %v1687_v51 = vadd.f32 1e-05, %v1685_v61 }
 0x5f2   : > { %2295 = vrsqrt.f32 %v1687_v51  ;;  %vm1695_vm1 = vweird.f32 %v1687_v51 }
 0x5f3   : > { %v1678_v47 = vpop.f32.mrf.mxu0 }
 0x5f4   : > { %v1684_v53 = vsub.f32 %v1678_v47, %v1682_v33 }
 0x5f6   : > { %v1686_v32 = vmax.f32 %v1684_v53, 0.0 }
 0x5f8   : > { %v2296_v48 = vpop.eup %2295  ;;  %v1688_v54 = vadd.f32 1e-05, %v1686_v32 }
 0x5f9   : > { %v1690_v2 = vmul.f32 %v2296_v48, %v1687_v51  ;;  %vm1696_vm0 = vweird.f32 %v2296_v48 }
 0x5fa   : > { %2297 = vrsqrt.f32 %v1688_v54  ;;  %vm1697_vm2 = vmor %vm1695_vm1, %vm1696_vm0  ;;  %vm1705_vm4 = vweird.f32 %v1688_v54 }
 0x5fb   : > { %v1691_v31 = vmul.f32 %v2296_v48, %v1690_v2 }
 0x5fd   : > { %v1692_v34 = vmul.f32 0.5, %v1691_v31 }
 0x5ff   : > { %v1693_v9 = vsub.f32 1.5, %v1692_v34 }
 0x600   : > { %v2298_v37 = vpop.eup %2297 }
 0x601   : > { %v1694_v56 = vmul.f32 %v2296_v48, %v1693_v9  ;;  %v1700_v35 = vmul.f32 %v2298_v37, %v1688_v54  ;;  %vm1706_vm3 = vweird.f32 %v2298_v37 }
 0x602   : > { %vm1707_vm5 = vmor %vm1705_vm4, %vm1706_vm3 }
 0x603   : > { %v1698_v55 = vsel %vm1697_vm2, %v2296_v48, %v1694_v56  ;;  %v1701_v10 = vmul.f32 %v2298_v37, %v1700_v35 }
 0x604   : > { %v1719_v39 = vmul.f32 %v1712_v45, %v1698_v55 }
 0x605   : > { %v1702_v49 = vmul.f32 0.5, %v1701_v10 }
 0x606   : > { %2142 = vmatmul.msk.f32.vlgmr.msra.gmra.mxu1 %vm1089_vm13, %v1719_v39  ;;  %2146 = vmatmul.msk.f32.vlgmr.msrb.gmra.mxu3 %vm1089_vm13, %v1719_v39  ;;  %v1721_v40 = vmul.f32 %v1719_v39, %v1669_v38 }
 0x607   : > { %v1703_v13 = vsub.f32 1.5, %v1702_v49 }
 0x608   : > { %v1733_v59 = vsub.f32 %v1726_v57, %v1721_v40 }
 0x609   : > { %v1704_v50 = vmul.f32 %v2298_v37, %v1703_v13 }
 0x60b   : > { %v1708_v60 = vsel %vm1707_vm5, %v2298_v37, %v1704_v50 }
 0x60c   : > { %v1720_v15 = vmul.f32 %v1717_v4, %v1708_v60 }
 0x60e   : > { %2143 = vmatmul.msk.f32.gmra.mxu1 %vm1089_vm13, %v1720_v15  ;;  %2147 = vmatmul.msk.f32.gmra.mxu3 %vm1089_vm13, %v1720_v15  ;;  %v1722_v18 = vmul.f32 %v1720_v15, %v1672_v58 }
 0x610   : > { %v1734_v14 = vsub.f32 %v1731_v20, %v1722_v18 }
 0x616   : > { %2144 = vmatmul.msk.f32.gmra.mxu1 %vm1089_vm13, %v1733_v59  ;;  %2148 = vmatmul.msk.f32.gmra.mxu3 %vm1089_vm13, %v1733_v59 }
 0x61e   : > { %2145 = vmatmul.msk.f32.gmra.mxu1 %vm1089_vm13, %v1734_v14  ;;  %2149 = vmatmul.msk.f32.gmra.mxu3 %vm1089_vm13, %v1734_v14 }
 0x683   : > { %v1764_v17 = vpop.f32.mrf.mxu1 }
 0x684   : > { %v1805_v24 = vmul.f32 %v1764_v17, %v3660_v23 }
 0x689   : > { %v1793_v19 = vpop.f32.mrf.mxu3 }
 0x68a   : > { %v1806_v41 = vmul.f32 %v1793_v19, %v3665_v26 }
 0x68b   : > { %v1767_v21 = vpop.f32.mrf.mxu1 }
 0x68c   : > { %v1807_v8 = vmul.f32 %v1767_v21, %v3669_v29 }
 0x691   : > { %v1796_v22 = vpop.f32.mrf.mxu3 }
 0x692   : > { %v1808_v26 = vmul.f32 %v1796_v22, %v3675_v0 }
 0x693   : > { %v1770_v25 = vpop.f32.mrf.mxu1 }
 0x694   : > { %v1809_v28 = vadd.f32 %v1805_v24, %v1770_v25 }
 0x696   : > { %v1817_v30 = vadd.f32 %v1813_v27, %v1809_v28 }
 0x698   : > { %v1821_v43 = vmax.f32 %v1817_v30, 0.0 }
 0x699   : > { %v1799_v5 = vpop.f32.mrf.mxu3 }
 0x69a   : > { %1825 = vst [vmem:[%s454_s25] sm:$0xff] %v1821_v43  ;;  %v1810_v62 = vadd.f32 %v1806_v41, %v1799_v5 }
 0x69b   : > { %v1773_v3 = vpop.f32.mrf.mxu1 }
 0x69c   : > { %v1818_v23 = vadd.f32 %v1814_v36, %v1810_v62  ;;  %v1811_v7 = vadd.f32 %v1807_v8, %v1773_v3 }
 0x69e   : > { %v1822_v6 = vmax.f32 %v1818_v23, 0.0  ;;  %v1819_v11 = vadd.f32 %v1815_v52, %v1811_v7 }
 0x6a0   : > { %1826 = vst [vmem:[%s454_s25 + $0x8] sm:$0xff] %v1822_v6  ;;  %v1823_v46 = vmax.f32 %v1819_v11, 0.0 }
 0x6a1   : > { %v1802_v29 = vpop.f32.mrf.mxu3 }
 0x6a2   : > { %1827 = vst [vmem:[%s454_s25 + $0x10] sm:$0xff] %v1823_v46  ;;  %v1812_v42 = vadd.f32 %v1808_v26, %v1802_v29 }
 0x6a4   : > { %v1820_v12 = vadd.f32 %v1816_v1, %v1812_v42 }
 0x6a6   : > { %v1824_v38 = vmax.f32 %v1820_v12, 0.0 }
 0x6a8   : > { %1828 = vst [vmem:[%s454_s25 + $0x18] sm:$0xff] %v1824_v38 }
 0x6a9   : > { %2469 = shalt.err (!%p2466_p10)
}
 0x6aa   : > { %s2534_s22 = smov 256  }
 0x6ab   : > { %2211 = dma.vmem_to_hbm [thread:$0]  (%p2678_p7), %s1843_s4, 512, %s1845_s19, %s1830_s21, %s2534_s22, %s2534_s22, %s3781_s30  }
 0x6ac PF: > { %s1859_s25 = sand.u32 1, %s2504_s17   ;;  %p3784_p12 = scmp.ge.s32.totalorder %s2516_s20, 2 }
 0x6ad   : > { %s1860_s23 = scalar_lea.sflag [#allocation5], %s1859_s25 }
 0x6ae   : > { %p2228_p13 = pnand %p3784_p12, %p2630_p6 }
 0x6b0   : > { %p2229_p0 = pneg %p2228_p13 }
 0x6b2   : > { %2499 = dma.done.wait (%p2229_p0), %s1860_s23, 512  }
 0x6b3   : > { %2501 = vsyncadd (%p2229_p0), %s1860_s23, 4294966784  ;;  %s3785_s28 = sld [smem:[#allocation16_spill]]  ;;  %p26_p3 = scmp.ge.s32.totalorder %s2662_s27, 4  }
 0x6b4   : > { %s3786_s19 = sld [smem:[#allocation17_spill]]  ;;  %s3787_s17 = smov %s2508_s18 }
 0x6b5   : > { %s3789_s20 = smov %s2662_s27  ;;  %28 = sbr.rel (!%p26_p3) target bundleno = 11 (0xb), region = 121 }
 0x6b9   : > { %s3788_s18 = smov %s3785_s28 }
 0x6ba   :  { %1866 = vsyncpa [#allocation4], 1 }
 0x6bb   :  { %1868 = vsyncpa [#allocation4 + $0x1], 1 }
 0x6bc   :  { %1869 = vsyncpa [#allocation7], 1 }
 0x6bd   :  { %1870 = vsyncpa [#allocation10], 1 }
 0x6be   :  { %1871 = vsyncpa [#allocation5], 1 }
 0x6bf   :  { %1873 = vsyncpa [#allocation5 + $0x1], 1 }

</bundles_post_ra>
